<compile_context>
chip_gen: v6e
topology: v6e:2x2x1
jax: 0.10.0
libtpu: 0.0.40
codegen_flags: <defaults>
</compile_context>

<pallas_src>
import functools

import numpy as np

import jax
import jax.numpy as jnp
from jax import lax
from jax.experimental import pallas as pl
from jax.experimental.pallas import tpu as pltpu

EPS = 1e-5

# 3x3 tap offsets (dh, dw), row-major: tap index t == (dh+1)*3 + (dw+1),
# matching the (kh, kw, ci) column ordering of the reshaped weights.
_TAP_OFFSETS = tuple((dh, dw) for dh in (-1, 0, 1) for dw in (-1, 0, 1))


def _residual_block_kernel(x_ref, masks_ref, w1_ref, g1_ref, b1_ref,
                           w2_ref, g2_ref, b2_ref, o_ref,
                           pad_ref, col_ref, *, width, lane_pad):
    """Fused conv3x3+BN+ReLU -> conv3x3+BN -> +residual -> ReLU.

    x_ref     : (C, NHW)   channel-major, spatially flattened input (= residual)
    masks_ref : (9, NHW)   1.0 where a tap stays inside the image, else 0.0
    w*_ref    : (C, KPAD)  weights as (Cout, 9*Cin) columns (kh, kw, ci), K zero-padded
    g*_ref/b*_ref : (C, 1) BatchNorm affine parameters
    o_ref     : (C, NHW)
    pad_ref   : (C, lane_pad + NHW + lane_pad) VMEM staging buffer for shifted taps
    col_ref   : (KPAD, NHW) VMEM im2col matrix
    """
    x = x_ref[...]                       # also the residual
    masks = masks_ref[...]
    c = x.shape[0]
    nhw = x.shape[-1]

    # Zero once: the staging borders and the K-padding rows of the im2col
    # buffer stay zero for both convolutions.
    pad_ref[...] = jnp.zeros_like(pad_ref)
    col_ref[...] = jnp.zeros_like(col_ref)

    def conv3x3_bn(src, w_mat, gamma, beta):
        # Stage the activation in the middle of the zero-padded scratch so the
        # nine spatially shifted copies are plain static slice loads.
        pad_ref[:, lane_pad:lane_pad + nhw] = src
        for t, (dh, dw) in enumerate(_TAP_OFFSETS):
            off = dh * width + dw
            tap = pad_ref[:, lane_pad + off:lane_pad + off + nhw]    # (C, NHW)
            col_ref[t * c:(t + 1) * c, :] = tap * masks[t:t + 1, :]
        # One MXU matmul: (Cout, KPAD) @ (KPAD, NHW) -> (Cout, NHW), f32 accum.
        acc = jnp.dot(w_mat, col_ref[...],
                      preferred_element_type=jnp.float32,
                      precision=lax.Precision.HIGHEST)
        # BatchNorm2d, training-mode batch statistics (biased variance),
        # one pass: per-channel sum and sum-of-squares over N*H*W (lane reduce).
        inv_n = 1.0 / nhw
        mean = jnp.sum(acc, axis=1, keepdims=True) * inv_n
        var = jnp.sum(acc * acc, axis=1, keepdims=True) * inv_n - mean * mean
        return (acc - mean) * lax.rsqrt(var + EPS) * gamma + beta

    out = conv3x3_bn(x, w1_ref[...], g1_ref[...], b1_ref[...])
    out = jnp.maximum(out, 0.0)                               # ReLU
    out = conv3x3_bn(out, w2_ref[...], g2_ref[...], b2_ref[...])
    o_ref[...] = jnp.maximum(out + x, 0.0)                    # + residual, ReLU


def _tap_masks(n, h, w):
    """(9, N*H*W) float32 masks: 1.0 where tap (dh, dw) reads inside the image."""
    hh = np.arange(h)[:, None]
    ww = np.arange(w)[None, :]
    rows = []
    for dh, dw in _TAP_OFFSETS:
        valid = ((hh + dh >= 0) & (hh + dh < h) &
                 (ww + dw >= 0) & (ww + dw < w))
        rows.append(np.tile(valid.reshape(-1).astype(np.float32), n))
    return jnp.asarray(np.stack(rows, axis=0))


def _full_spec(shape):
    # Whole-array block resident in VMEM (BN needs full (N, H, W) visibility,
    # and the problem is a few hundred KiB).
    return pl.BlockSpec(shape, lambda i: (0,) * len(shape),
                        memory_space=pltpu.MemorySpace.VMEM)


@jax.jit
def residual_block(x_nchw, w1, g1, b1, w2, g2, b2):
    """Forward pass of ResidualBlock (stride=1, downsample=None)."""
    n, c, h, w = x_nchw.shape
    nhw = n * h * w
    k9 = 9 * c
    kpad = ((k9 + 127) // 128) * 128          # pad contraction dim to a lane tile
    lane_pad = ((w + 1 + 127) // 128) * 128   # >= w+1, keeps the interior store aligned

    # Channel-major, spatially flattened activations: lanes carry N*H*W.
    x_cm = jnp.transpose(x_nchw, (1, 0, 2, 3)).reshape(c, nhw).astype(jnp.float32)
    masks = _tap_masks(n, h, w)

    def wmat(wt):
        # (3, 3, Cin, Cout) HWIO -> (Cout, 9*Cin), columns ordered (kh, kw, ci),
        # zero-padded along K to kpad.
        m = jnp.transpose(wt, (3, 0, 1, 2)).reshape(c, k9).astype(jnp.float32)
        return jnp.pad(m, ((0, 0), (0, kpad - k9)))

    def colvec(v):
        return v.reshape(-1, 1).astype(jnp.float32)

    args = (x_cm, masks, wmat(w1), colvec(g1), colvec(b1),
            wmat(w2), colvec(g2), colvec(b2))

    out_cm = pl.pallas_call(
        functools.partial(_residual_block_kernel, width=w, lane_pad=lane_pad),
        grid=(1,),
        in_specs=[_full_spec(a.shape) for a in args],
        out_specs=_full_spec((c, nhw)),
        out_shape=jax.ShapeDtypeStruct((c, nhw), jnp.float32),
        scratch_shapes=[
            pltpu.VMEM((c, lane_pad + nhw + lane_pad), jnp.float32),  # shift staging
            pltpu.VMEM((kpad, nhw), jnp.float32),                     # im2col matrix
        ],
        compiler_params=pltpu.CompilerParams(
            dimension_semantics=("arbitrary",)),
    )(*args)

    return jnp.transpose(out_cm.reshape(c, n, h, w), (1, 0, 2, 3))   # -> NCHW


def residual_block_reference(x_nchw, w1, g1, b1, w2, g2, b2):
    """Pure-JAX reference matching the PyTorch module semantics."""
    x = jnp.transpose(x_nchw, (0, 2, 3, 1)).astype(jnp.float32)      # NCHW -> NHWC

    def conv(y, wt):
        return lax.conv_general_dilated(
            y, wt, window_strides=(1, 1), padding=((1, 1), (1, 1)),
            dimension_numbers=("NHWC", "HWIO", "NHWC"),
            precision=lax.Precision.HIGHEST)

    def bn(y, g, b):
        mean = jnp.mean(y, axis=(0, 1, 2), keepdims=True)
        var = jnp.mean(jnp.square(y - mean), axis=(0, 1, 2), keepdims=True)
        return (y - mean) * lax.rsqrt(var + EPS) * g + b

    out = jax.nn.relu(bn(conv(x, w1), g1, b1))
    out = bn(conv(out, w2), g2, b2)
    out = jax.nn.relu(out + x)
    return jnp.transpose(out, (0, 3, 1, 2))


if __name__ == "__main__":
    # Small synthetic config: in_channels = out_channels = 8, stride = 1.
    N, C, H, W = 2, 8, 16, 16

    key = jax.random.PRNGKey(0)
    k = jax.random.split(key, 7)
    x = jax.random.normal(k[0], (N, C, H, W), jnp.float32)           # NCHW input
    # conv3x3 weights stored directly in HWIO layout (3, 3, Cin, Cout).
    w1 = 0.1 * jax.random.normal(k[1], (3, 3, C, C), jnp.float32)
    w2 = 0.1 * jax.random.normal(k[2], (3, 3, C, C), jnp.float32)
    g1 = 1.0 + 0.1 * jax.random.normal(k[3], (C,), jnp.float32)
    b1 = 0.1 * jax.random.normal(k[4], (C,), jnp.float32)
    g2 = 1.0 + 0.1 * jax.random.normal(k[5], (C,), jnp.float32)
    b2 = 0.1 * jax.random.normal(k[6], (C,), jnp.float32)

    out = jax.block_until_ready(residual_block(x, w1, g1, b1, w2, g2, b2))
    assert out.shape == (N, C, H, W) and out.dtype == jnp.float32

    ref = jax.block_until_ready(residual_block_reference(x, w1, g1, b1, w2, g2, b2))
    err = float(jnp.max(jnp.abs(out - ref)))
    assert err < 1e-3, f"max abs error vs reference: {err}"

    print("KERNEL_OK")
</pallas_src>

<mosaic_0001>
module attributes {stable_mosaic.version = 11 : i64} {
  func.func @_residual_block_kernel(%arg0: i32, %arg1: memref<8x512xf32, #tpu.memory_space<vmem>>, %arg2: memref<9x512xf32, #tpu.memory_space<vmem>>, %arg3: memref<8x128xf32, #tpu.memory_space<vmem>>, %arg4: memref<8x1xf32, #tpu.memory_space<vmem>>, %arg5: memref<8x1xf32, #tpu.memory_space<vmem>>, %arg6: memref<8x128xf32, #tpu.memory_space<vmem>>, %arg7: memref<8x1xf32, #tpu.memory_space<vmem>>, %arg8: memref<8x1xf32, #tpu.memory_space<vmem>>, %arg9: memref<8x512xf32, #tpu.memory_space<vmem>>, %arg10: memref<8x768xf32, #tpu.memory_space<vmem>>, %arg11: memref<128x512xf32, #tpu.memory_space<vmem>>) attributes {dimension_semantics = [#tpu.dimension_semantics<arbitrary>], iteration_bounds = array<i64: 1>, scalar_prefetch = 0 : i64, scratch_operands = 2 : i64, tpu.core_type = #tpu.core_type<tc>, window_params = [{pipeline_mode = #tpu.pipeline_mode<synchronous>, transform_indices = @transform_0, window_bounds = array<i64: 8, 512>}, {pipeline_mode = #tpu.pipeline_mode<synchronous>, transform_indices = @transform_1, window_bounds = array<i64: 9, 512>}, {pipeline_mode = #tpu.pipeline_mode<synchronous>, transform_indices = @transform_2, window_bounds = array<i64: 8, 128>}, {pipeline_mode = #tpu.pipeline_mode<synchronous>, transform_indices = @transform_3, window_bounds = array<i64: 8, 1>}, {pipeline_mode = #tpu.pipeline_mode<synchronous>, transform_indices = @transform_4, window_bounds = array<i64: 8, 1>}, {pipeline_mode = #tpu.pipeline_mode<synchronous>, transform_indices = @transform_5, window_bounds = array<i64: 8, 128>}, {pipeline_mode = #tpu.pipeline_mode<synchronous>, transform_indices = @transform_6, window_bounds = array<i64: 8, 1>}, {pipeline_mode = #tpu.pipeline_mode<synchronous>, transform_indices = @transform_7, window_bounds = array<i64: 8, 1>}, {pipeline_mode = #tpu.pipeline_mode<synchronous>, transform_indices = @transform_8, window_bounds = array<i64: 8, 512>}]} {
    %c0 = arith.constant 0 : index
    %c0_0 = arith.constant 0 : index
    %0 = vector.load %arg1[%c0, %c0_0] : memref<8x512xf32, #tpu.memory_space<vmem>>, vector<8x512xf32>
    %c0_1 = arith.constant 0 : index
    %c0_2 = arith.constant 0 : index
    %1 = vector.load %arg2[%c0_1, %c0_2] : memref<9x512xf32, #tpu.memory_space<vmem>>, vector<9x512xf32>
    %cst = arith.constant 0.000000e+00 : f32
    %2 = vector.broadcast %cst : f32 to vector<8x768xf32>
    %c0_3 = arith.constant 0 : index
    %c0_4 = arith.constant 0 : index
    %3 = vector.load %arg10[%c0_3, %c0_4] : memref<8x768xf32, #tpu.memory_space<vmem>>, vector<8x768xf32>
    tpu.vector_store %arg10[%c0_3, %c0_4], %2 {strides = array<i32>} : memref<8x768xf32, #tpu.memory_space<vmem>>, vector<8x768xf32>,
    %cst_5 = arith.constant 0.000000e+00 : f32
    %4 = vector.broadcast %cst_5 : f32 to vector<128x512xf32>
    %c0_6 = arith.constant 0 : index
    %c0_7 = arith.constant 0 : index
    %5 = vector.load %arg11[%c0_6, %c0_7] : memref<128x512xf32, #tpu.memory_space<vmem>>, vector<128x512xf32>
    tpu.vector_store %arg11[%c0_6, %c0_7], %4 {strides = array<i32>} : memref<128x512xf32, #tpu.memory_space<vmem>>, vector<128x512xf32>,
    %c0_8 = arith.constant 0 : index
    %c0_9 = arith.constant 0 : index
    %6 = vector.load %arg3[%c0_8, %c0_9] : memref<8x128xf32, #tpu.memory_space<vmem>>, vector<8x128xf32>
    %c0_10 = arith.constant 0 : index
    %c0_11 = arith.constant 0 : index
    %7 = vector.load %arg4[%c0_10, %c0_11] : memref<8x1xf32, #tpu.memory_space<vmem>>, vector<8x1xf32>
    %c0_12 = arith.constant 0 : index
    %c0_13 = arith.constant 0 : index
    %8 = vector.load %arg5[%c0_12, %c0_13] : memref<8x1xf32, #tpu.memory_space<vmem>>, vector<8x1xf32>
    %c0_14 = arith.constant 0 : index
    %c128 = arith.constant 128 : index
    %9 = vector.load %arg10[%c0_14, %c128] : memref<8x768xf32, #tpu.memory_space<vmem>>, vector<8x512xf32>
    tpu.vector_store %arg10[%c0_14, %c128], %0 {strides = array<i32>} : memref<8x768xf32, #tpu.memory_space<vmem>>, vector<8x512xf32>,
    %c0_15 = arith.constant 0 : index
    %c111 = arith.constant 111 : index
    %10 = vector.load %arg10[%c0_15, %c111] : memref<8x768xf32, #tpu.memory_space<vmem>>, vector<8x512xf32>
    %11 = vector.extract_strided_slice %1 {offsets = [0, 0], sizes = [1, 512], strides = [1, 1]} : vector<9x512xf32> to vector<1x512xf32>
    %12 = vector.broadcast %11 : vector<1x512xf32> to vector<8x512xf32>
    %13 = arith.mulf %10, %12 : vector<8x512xf32>
    %c0_16 = arith.constant 0 : index
    %c0_17 = arith.constant 0 : index
    %14 = vector.load %arg11[%c0_16, %c0_17] : memref<128x512xf32, #tpu.memory_space<vmem>>, vector<8x512xf32>
    tpu.vector_store %arg11[%c0_16, %c0_17], %13 {strides = array<i32>} : memref<128x512xf32, #tpu.memory_space<vmem>>, vector<8x512xf32>,
    %c0_18 = arith.constant 0 : index
    %c112 = arith.constant 112 : index
    %15 = vector.load %arg10[%c0_18, %c112] : memref<8x768xf32, #tpu.memory_space<vmem>>, vector<8x512xf32>
    %16 = vector.extract_strided_slice %1 {offsets = [1, 0], sizes = [1, 512], strides = [1, 1]} : vector<9x512xf32> to vector<1x512xf32>
    %17 = vector.broadcast %16 : vector<1x512xf32> to vector<8x512xf32>
    %18 = arith.mulf %15, %17 : vector<8x512xf32>
    %c8 = arith.constant 8 : index
    %c0_19 = arith.constant 0 : index
    %19 = vector.load %arg11[%c8, %c0_19] : memref<128x512xf32, #tpu.memory_space<vmem>>, vector<8x512xf32>
    tpu.vector_store %arg11[%c8, %c0_19], %18 {strides = array<i32>} : memref<128x512xf32, #tpu.memory_space<vmem>>, vector<8x512xf32>,
    %c0_20 = arith.constant 0 : index
    %c113 = arith.constant 113 : index
    %20 = vector.load %arg10[%c0_20, %c113] : memref<8x768xf32, #tpu.memory_space<vmem>>, vector<8x512xf32>
    %21 = vector.extract_strided_slice %1 {offsets = [2, 0], sizes = [1, 512], strides = [1, 1]} : vector<9x512xf32> to vector<1x512xf32>
    %22 = vector.broadcast %21 : vector<1x512xf32> to vector<8x512xf32>
    %23 = arith.mulf %20, %22 : vector<8x512xf32>
    %c16 = arith.constant 16 : index
    %c0_21 = arith.constant 0 : index
    %24 = vector.load %arg11[%c16, %c0_21] : memref<128x512xf32, #tpu.memory_space<vmem>>, vector<8x512xf32>
    tpu.vector_store %arg11[%c16, %c0_21], %23 {strides = array<i32>} : memref<128x512xf32, #tpu.memory_space<vmem>>, vector<8x512xf32>,
    %c0_22 = arith.constant 0 : index
    %c127 = arith.constant 127 : index
    %25 = vector.load %arg10[%c0_22, %c127] : memref<8x768xf32, #tpu.memory_space<vmem>>, vector<8x512xf32>
    %26 = vector.extract_strided_slice %1 {offsets = [3, 0], sizes = [1, 512], strides = [1, 1]} : vector<9x512xf32> to vector<1x512xf32>
    %27 = vector.broadcast %26 : vector<1x512xf32> to vector<8x512xf32>
    %28 = arith.mulf %25, %27 : vector<8x512xf32>
    %c24 = arith.constant 24 : index
    %c0_23 = arith.constant 0 : index
    %29 = vector.load %arg11[%c24, %c0_23] : memref<128x512xf32, #tpu.memory_space<vmem>>, vector<8x512xf32>
    tpu.vector_store %arg11[%c24, %c0_23], %28 {strides = array<i32>} : memref<128x512xf32, #tpu.memory_space<vmem>>, vector<8x512xf32>,
    %c0_24 = arith.constant 0 : index
    %c128_25 = arith.constant 128 : index
    %30 = vector.load %arg10[%c0_24, %c128_25] : memref<8x768xf32, #tpu.memory_space<vmem>>, vector<8x512xf32>
    %31 = vector.extract_strided_slice %1 {offsets = [4, 0], sizes = [1, 512], strides = [1, 1]} : vector<9x512xf32> to vector<1x512xf32>
    %32 = vector.broadcast %31 : vector<1x512xf32> to vector<8x512xf32>
    %33 = arith.mulf %30, %32 : vector<8x512xf32>
    %c32 = arith.constant 32 : index
    %c0_26 = arith.constant 0 : index
    %34 = vector.load %arg11[%c32, %c0_26] : memref<128x512xf32, #tpu.memory_space<vmem>>, vector<8x512xf32>
    tpu.vector_store %arg11[%c32, %c0_26], %33 {strides = array<i32>} : memref<128x512xf32, #tpu.memory_space<vmem>>, vector<8x512xf32>,
    %c0_27 = arith.constant 0 : index
    %c129 = arith.constant 129 : index
    %35 = vector.load %arg10[%c0_27, %c129] : memref<8x768xf32, #tpu.memory_space<vmem>>, vector<8x512xf32>
    %36 = vector.extract_strided_slice %1 {offsets = [5, 0], sizes = [1, 512], strides = [1, 1]} : vector<9x512xf32> to vector<1x512xf32>
    %37 = vector.broadcast %36 : vector<1x512xf32> to vector<8x512xf32>
    %38 = arith.mulf %35, %37 : vector<8x512xf32>
    %c40 = arith.constant 40 : index
    %c0_28 = arith.constant 0 : index
    %39 = vector.load %arg11[%c40, %c0_28] : memref<128x512xf32, #tpu.memory_space<vmem>>, vector<8x512xf32>
    tpu.vector_store %arg11[%c40, %c0_28], %38 {strides = array<i32>} : memref<128x512xf32, #tpu.memory_space<vmem>>, vector<8x512xf32>,
    %c0_29 = arith.constant 0 : index
    %c143 = arith.constant 143 : index
    %40 = vector.load %arg10[%c0_29, %c143] : memref<8x768xf32, #tpu.memory_space<vmem>>, vector<8x512xf32>
    %41 = vector.extract_strided_slice %1 {offsets = [6, 0], sizes = [1, 512], strides = [1, 1]} : vector<9x512xf32> to vector<1x512xf32>
    %42 = vector.broadcast %41 : vector<1x512xf32> to vector<8x512xf32>
    %43 = arith.mulf %40, %42 : vector<8x512xf32>
    %c48 = arith.constant 48 : index
    %c0_30 = arith.constant 0 : index
    %44 = vector.load %arg11[%c48, %c0_30] : memref<128x512xf32, #tpu.memory_space<vmem>>, vector<8x512xf32>
    tpu.vector_store %arg11[%c48, %c0_30], %43 {strides = array<i32>} : memref<128x512xf32, #tpu.memory_space<vmem>>, vector<8x512xf32>,
    %c0_31 = arith.constant 0 : index
    %c144 = arith.constant 144 : index
    %45 = vector.load %arg10[%c0_31, %c144] : memref<8x768xf32, #tpu.memory_space<vmem>>, vector<8x512xf32>
    %46 = vector.extract_strided_slice %1 {offsets = [7, 0], sizes = [1, 512], strides = [1, 1]} : vector<9x512xf32> to vector<1x512xf32>
    %47 = vector.broadcast %46 : vector<1x512xf32> to vector<8x512xf32>
    %48 = arith.mulf %45, %47 : vector<8x512xf32>
    %c56 = arith.constant 56 : index
    %c0_32 = arith.constant 0 : index
    %49 = vector.load %arg11[%c56, %c0_32] : memref<128x512xf32, #tpu.memory_space<vmem>>, vector<8x512xf32>
    tpu.vector_store %arg11[%c56, %c0_32], %48 {strides = array<i32>} : memref<128x512xf32, #tpu.memory_space<vmem>>, vector<8x512xf32>,
    %c0_33 = arith.constant 0 : index
    %c145 = arith.constant 145 : index
    %50 = vector.load %arg10[%c0_33, %c145] : memref<8x768xf32, #tpu.memory_space<vmem>>, vector<8x512xf32>
    %51 = vector.extract_strided_slice %1 {offsets = [8, 0], sizes = [1, 512], strides = [1, 1]} : vector<9x512xf32> to vector<1x512xf32>
    %52 = vector.broadcast %51 : vector<1x512xf32> to vector<8x512xf32>
    %53 = arith.mulf %50, %52 : vector<8x512xf32>
    %c64 = arith.constant 64 : index
    %c0_34 = arith.constant 0 : index
    %54 = vector.load %arg11[%c64, %c0_34] : memref<128x512xf32, #tpu.memory_space<vmem>>, vector<8x512xf32>
    tpu.vector_store %arg11[%c64, %c0_34], %53 {strides = array<i32>} : memref<128x512xf32, #tpu.memory_space<vmem>>, vector<8x512xf32>,
    %c0_35 = arith.constant 0 : index
    %c0_36 = arith.constant 0 : index
    %55 = vector.load %arg11[%c0_35, %c0_36] : memref<128x512xf32, #tpu.memory_space<vmem>>, vector<128x512xf32>
    %cst_37 = arith.constant dense<0.000000e+00> : vector<8x512xf32>
    %56 = tpu.matmul %6, %55, %cst_37 {dimension_numbers = #tpu.dot_dimension_numbers<[1], [0], [0], [1], [0, 0, 1, 1], [], []>, precision = #tpu.contract_precision<fp32>} : vector<8x128xf32>, vector<128x512xf32>, vector<8x512xf32> -> vector<8x512xf32>
    %cst_38 = arith.constant dense<0.000000e+00> : vector<8xf32>
    %57 = vector.multi_reduction <add>, %56, %cst_38 [1] : vector<8x512xf32> to vector<8xf32>
    %58 = vector.shape_cast %57 : vector<8xf32> to vector<8x1xf32>
    %cst_39 = arith.constant 0.001953125 : f32
    %59 = vector.broadcast %cst_39 : f32 to vector<8x1xf32>
    %60 = arith.mulf %58, %59 : vector<8x1xf32>
    %61 = arith.mulf %56, %56 : vector<8x512xf32>
    %cst_40 = arith.constant dense<0.000000e+00> : vector<8xf32>
    %62 = vector.multi_reduction <add>, %61, %cst_40 [1] : vector<8x512xf32> to vector<8xf32>
    %63 = vector.shape_cast %62 : vector<8xf32> to vector<8x1xf32>
    %cst_41 = arith.constant 0.001953125 : f32
    %64 = vector.broadcast %cst_41 : f32 to vector<8x1xf32>
    %65 = arith.mulf %63, %64 : vector<8x1xf32>
    %66 = arith.mulf %60, %60 : vector<8x1xf32>
    %67 = arith.subf %65, %66 : vector<8x1xf32>
    %68 = vector.broadcast %60 : vector<8x1xf32> to vector<8x512xf32>
    %69 = arith.subf %56, %68 : vector<8x512xf32>
    %cst_42 = arith.constant 9.99999974E-6 : f32
    %70 = vector.broadcast %cst_42 : f32 to vector<8x1xf32>
    %71 = arith.addf %67, %70 : vector<8x1xf32>
    %72 = math.rsqrt %71 : vector<8x1xf32>
    %73 = vector.broadcast %72 : vector<8x1xf32> to vector<8x512xf32>
    %74 = arith.mulf %69, %73 : vector<8x512xf32>
    %75 = vector.broadcast %7 : vector<8x1xf32> to vector<8x512xf32>
    %76 = arith.mulf %74, %75 : vector<8x512xf32>
    %77 = vector.broadcast %8 : vector<8x1xf32> to vector<8x512xf32>
    %78 = arith.addf %76, %77 : vector<8x512xf32>
    %cst_43 = arith.constant 0.000000e+00 : f32
    %79 = vector.broadcast %cst_43 : f32 to vector<8x512xf32>
    %80 = arith.maximumf %78, %79 : vector<8x512xf32>
    %c0_44 = arith.constant 0 : index
    %c0_45 = arith.constant 0 : index
    %81 = vector.load %arg6[%c0_44, %c0_45] : memref<8x128xf32, #tpu.memory_space<vmem>>, vector<8x128xf32>
    %c0_46 = arith.constant 0 : index
    %c0_47 = arith.constant 0 : index
    %82 = vector.load %arg7[%c0_46, %c0_47] : memref<8x1xf32, #tpu.memory_space<vmem>>, vector<8x1xf32>
    %c0_48 = arith.constant 0 : index
    %c0_49 = arith.constant 0 : index
    %83 = vector.load %arg8[%c0_48, %c0_49] : memref<8x1xf32, #tpu.memory_space<vmem>>, vector<8x1xf32>
    %c0_50 = arith.constant 0 : index
    %c128_51 = arith.constant 128 : index
    %84 = vector.load %arg10[%c0_50, %c128_51] : memref<8x768xf32, #tpu.memory_space<vmem>>, vector<8x512xf32>
    tpu.vector_store %arg10[%c0_50, %c128_51], %80 {strides = array<i32>} : memref<8x768xf32, #tpu.memory_space<vmem>>, vector<8x512xf32>,
    %c0_52 = arith.constant 0 : index
    %c111_53 = arith.constant 111 : index
    %85 = vector.load %arg10[%c0_52, %c111_53] : memref<8x768xf32, #tpu.memory_space<vmem>>, vector<8x512xf32>
    %86 = vector.extract_strided_slice %1 {offsets = [0, 0], sizes = [1, 512], strides = [1, 1]} : vector<9x512xf32> to vector<1x512xf32>
    %87 = vector.broadcast %86 : vector<1x512xf32> to vector<8x512xf32>
    %88 = arith.mulf %85, %87 : vector<8x512xf32>
    %c0_54 = arith.constant 0 : index
    %c0_55 = arith.constant 0 : index
    %89 = vector.load %arg11[%c0_54, %c0_55] : memref<128x512xf32, #tpu.memory_space<vmem>>, vector<8x512xf32>
    tpu.vector_store %arg11[%c0_54, %c0_55], %88 {strides = array<i32>} : memref<128x512xf32, #tpu.memory_space<vmem>>, vector<8x512xf32>,
    %c0_56 = arith.constant 0 : index
    %c112_57 = arith.constant 112 : index
    %90 = vector.load %arg10[%c0_56, %c112_57] : memref<8x768xf32, #tpu.memory_space<vmem>>, vector<8x512xf32>
    %91 = vector.extract_strided_slice %1 {offsets = [1, 0], sizes = [1, 512], strides = [1, 1]} : vector<9x512xf32> to vector<1x512xf32>
    %92 = vector.broadcast %91 : vector<1x512xf32> to vector<8x512xf32>
    %93 = arith.mulf %90, %92 : vector<8x512xf32>
    %c8_58 = arith.constant 8 : index
    %c0_59 = arith.constant 0 : index
    %94 = vector.load %arg11[%c8_58, %c0_59] : memref<128x512xf32, #tpu.memory_space<vmem>>, vector<8x512xf32>
    tpu.vector_store %arg11[%c8_58, %c0_59], %93 {strides = array<i32>} : memref<128x512xf32, #tpu.memory_space<vmem>>, vector<8x512xf32>,
    %c0_60 = arith.constant 0 : index
    %c113_61 = arith.constant 113 : index
    %95 = vector.load %arg10[%c0_60, %c113_61] : memref<8x768xf32, #tpu.memory_space<vmem>>, vector<8x512xf32>
    %96 = vector.extract_strided_slice %1 {offsets = [2, 0], sizes = [1, 512], strides = [1, 1]} : vector<9x512xf32> to vector<1x512xf32>
    %97 = vector.broadcast %96 : vector<1x512xf32> to vector<8x512xf32>
    %98 = arith.mulf %95, %97 : vector<8x512xf32>
    %c16_62 = arith.constant 16 : index
    %c0_63 = arith.constant 0 : index
    %99 = vector.load %arg11[%c16_62, %c0_63] : memref<128x512xf32, #tpu.memory_space<vmem>>, vector<8x512xf32>
    tpu.vector_store %arg11[%c16_62, %c0_63], %98 {strides = array<i32>} : memref<128x512xf32, #tpu.memory_space<vmem>>, vector<8x512xf32>,
    %c0_64 = arith.constant 0 : index
    %c127_65 = arith.constant 127 : index
    %100 = vector.load %arg10[%c0_64, %c127_65] : memref<8x768xf32, #tpu.memory_space<vmem>>, vector<8x512xf32>
    %101 = vector.extract_strided_slice %1 {offsets = [3, 0], sizes = [1, 512], strides = [1, 1]} : vector<9x512xf32> to vector<1x512xf32>
    %102 = vector.broadcast %101 : vector<1x512xf32> to vector<8x512xf32>
    %103 = arith.mulf %100, %102 : vector<8x512xf32>
    %c24_66 = arith.constant 24 : index
    %c0_67 = arith.constant 0 : index
    %104 = vector.load %arg11[%c24_66, %c0_67] : memref<128x512xf32, #tpu.memory_space<vmem>>, vector<8x512xf32>
    tpu.vector_store %arg11[%c24_66, %c0_67], %103 {strides = array<i32>} : memref<128x512xf32, #tpu.memory_space<vmem>>, vector<8x512xf32>,
    %c0_68 = arith.constant 0 : index
    %c128_69 = arith.constant 128 : index
    %105 = vector.load %arg10[%c0_68, %c128_69] : memref<8x768xf32, #tpu.memory_space<vmem>>, vector<8x512xf32>
    %106 = vector.extract_strided_slice %1 {offsets = [4, 0], sizes = [1, 512], strides = [1, 1]} : vector<9x512xf32> to vector<1x512xf32>
    %107 = vector.broadcast %106 : vector<1x512xf32> to vector<8x512xf32>
    %108 = arith.mulf %105, %107 : vector<8x512xf32>
    %c32_70 = arith.constant 32 : index
    %c0_71 = arith.constant 0 : index
    %109 = vector.load %arg11[%c32_70, %c0_71] : memref<128x512xf32, #tpu.memory_space<vmem>>, vector<8x512xf32>
    tpu.vector_store %arg11[%c32_70, %c0_71], %108 {strides = array<i32>} : memref<128x512xf32, #tpu.memory_space<vmem>>, vector<8x512xf32>,
    %c0_72 = arith.constant 0 : index
    %c129_73 = arith.constant 129 : index
    %110 = vector.load %arg10[%c0_72, %c129_73] : memref<8x768xf32, #tpu.memory_space<vmem>>, vector<8x512xf32>
    %111 = vector.extract_strided_slice %1 {offsets = [5, 0], sizes = [1, 512], strides = [1, 1]} : vector<9x512xf32> to vector<1x512xf32>
    %112 = vector.broadcast %111 : vector<1x512xf32> to vector<8x512xf32>
    %113 = arith.mulf %110, %112 : vector<8x512xf32>
    %c40_74 = arith.constant 40 : index
    %c0_75 = arith.constant 0 : index
    %114 = vector.load %arg11[%c40_74, %c0_75] : memref<128x512xf32, #tpu.memory_space<vmem>>, vector<8x512xf32>
    tpu.vector_store %arg11[%c40_74, %c0_75], %113 {strides = array<i32>} : memref<128x512xf32, #tpu.memory_space<vmem>>, vector<8x512xf32>,
    %c0_76 = arith.constant 0 : index
    %c143_77 = arith.constant 143 : index
    %115 = vector.load %arg10[%c0_76, %c143_77] : memref<8x768xf32, #tpu.memory_space<vmem>>, vector<8x512xf32>
    %116 = vector.extract_strided_slice %1 {offsets = [6, 0], sizes = [1, 512], strides = [1, 1]} : vector<9x512xf32> to vector<1x512xf32>
    %117 = vector.broadcast %116 : vector<1x512xf32> to vector<8x512xf32>
    %118 = arith.mulf %115, %117 : vector<8x512xf32>
    %c48_78 = arith.constant 48 : index
    %c0_79 = arith.constant 0 : index
    %119 = vector.load %arg11[%c48_78, %c0_79] : memref<128x512xf32, #tpu.memory_space<vmem>>, vector<8x512xf32>
    tpu.vector_store %arg11[%c48_78, %c0_79], %118 {strides = array<i32>} : memref<128x512xf32, #tpu.memory_space<vmem>>, vector<8x512xf32>,
    %c0_80 = arith.constant 0 : index
    %c144_81 = arith.constant 144 : index
    %120 = vector.load %arg10[%c0_80, %c144_81] : memref<8x768xf32, #tpu.memory_space<vmem>>, vector<8x512xf32>
    %121 = vector.extract_strided_slice %1 {offsets = [7, 0], sizes = [1, 512], strides = [1, 1]} : vector<9x512xf32> to vector<1x512xf32>
    %122 = vector.broadcast %121 : vector<1x512xf32> to vector<8x512xf32>
    %123 = arith.mulf %120, %122 : vector<8x512xf32>
    %c56_82 = arith.constant 56 : index
    %c0_83 = arith.constant 0 : index
    %124 = vector.load %arg11[%c56_82, %c0_83] : memref<128x512xf32, #tpu.memory_space<vmem>>, vector<8x512xf32>
    tpu.vector_store %arg11[%c56_82, %c0_83], %123 {strides = array<i32>} : memref<128x512xf32, #tpu.memory_space<vmem>>, vector<8x512xf32>,
    %c0_84 = arith.constant 0 : index
    %c145_85 = arith.constant 145 : index
    %125 = vector.load %arg10[%c0_84, %c145_85] : memref<8x768xf32, #tpu.memory_space<vmem>>, vector<8x512xf32>
    %126 = vector.extract_strided_slice %1 {offsets = [8, 0], sizes = [1, 512], strides = [1, 1]} : vector<9x512xf32> to vector<1x512xf32>
    %127 = vector.broadcast %126 : vector<1x512xf32> to vector<8x512xf32>
    %128 = arith.mulf %125, %127 : vector<8x512xf32>
    %c64_86 = arith.constant 64 : index
    %c0_87 = arith.constant 0 : index
    %129 = vector.load %arg11[%c64_86, %c0_87] : memref<128x512xf32, #tpu.memory_space<vmem>>, vector<8x512xf32>
    tpu.vector_store %arg11[%c64_86, %c0_87], %128 {strides = array<i32>} : memref<128x512xf32, #tpu.memory_space<vmem>>, vector<8x512xf32>,
    %c0_88 = arith.constant 0 : index
    %c0_89 = arith.constant 0 : index
    %130 = vector.load %arg11[%c0_88, %c0_89] : memref<128x512xf32, #tpu.memory_space<vmem>>, vector<128x512xf32>
    %cst_90 = arith.constant dense<0.000000e+00> : vector<8x512xf32>
    %131 = tpu.matmul %81, %130, %cst_90 {dimension_numbers = #tpu.dot_dimension_numbers<[1], [0], [0], [1], [0, 0, 1, 1], [], []>, precision = #tpu.contract_precision<fp32>} : vector<8x128xf32>, vector<128x512xf32>, vector<8x512xf32> -> vector<8x512xf32>
    %cst_91 = arith.constant dense<0.000000e+00> : vector<8xf32>
    %132 = vector.multi_reduction <add>, %131, %cst_91 [1] : vector<8x512xf32> to vector<8xf32>
    %133 = vector.shape_cast %132 : vector<8xf32> to vector<8x1xf32>
    %cst_92 = arith.constant 0.001953125 : f32
    %134 = vector.broadcast %cst_92 : f32 to vector<8x1xf32>
    %135 = arith.mulf %133, %134 : vector<8x1xf32>
    %136 = arith.mulf %131, %131 : vector<8x512xf32>
    %cst_93 = arith.constant dense<0.000000e+00> : vector<8xf32>
    %137 = vector.multi_reduction <add>, %136, %cst_93 [1] : vector<8x512xf32> to vector<8xf32>
    %138 = vector.shape_cast %137 : vector<8xf32> to vector<8x1xf32>
    %cst_94 = arith.constant 0.001953125 : f32
    %139 = vector.broadcast %cst_94 : f32 to vector<8x1xf32>
    %140 = arith.mulf %138, %139 : vector<8x1xf32>
    %141 = arith.mulf %135, %135 : vector<8x1xf32>
    %142 = arith.subf %140, %141 : vector<8x1xf32>
    %143 = vector.broadcast %135 : vector<8x1xf32> to vector<8x512xf32>
    %144 = arith.subf %131, %143 : vector<8x512xf32>
    %cst_95 = arith.constant 9.99999974E-6 : f32
    %145 = vector.broadcast %cst_95 : f32 to vector<8x1xf32>
    %146 = arith.addf %142, %145 : vector<8x1xf32>
    %147 = math.rsqrt %146 : vector<8x1xf32>
    %148 = vector.broadcast %147 : vector<8x1xf32> to vector<8x512xf32>
    %149 = arith.mulf %144, %148 : vector<8x512xf32>
    %150 = vector.broadcast %82 : vector<8x1xf32> to vector<8x512xf32>
    %151 = arith.mulf %149, %150 : vector<8x512xf32>
    %152 = vector.broadcast %83 : vector<8x1xf32> to vector<8x512xf32>
    %153 = arith.addf %151, %152 : vector<8x512xf32>
    %154 = arith.addf %153, %0 : vector<8x512xf32>
    %cst_96 = arith.constant 0.000000e+00 : f32
    %155 = vector.broadcast %cst_96 : f32 to vector<8x512xf32>
    %156 = arith.maximumf %154, %155 : vector<8x512xf32>
    %c0_97 = arith.constant 0 : index
    %c0_98 = arith.constant 0 : index
    %157 = vector.load %arg9[%c0_97, %c0_98] : memref<8x512xf32, #tpu.memory_space<vmem>>, vector<8x512xf32>
    tpu.vector_store %arg9[%c0_97, %c0_98], %156 {strides = array<i32>} : memref<8x512xf32, #tpu.memory_space<vmem>>, vector<8x512xf32>,
    return
  }
  func.func @transform_0(%arg0: i32) -> (i32, i32) {
    %c0_i32 = arith.constant 0 : i32
    %c0_i32_0 = arith.constant 0 : i32
    %c0_i32_1 = arith.constant 0 : i32
    return %c0_i32, %c0_i32_0 : i32, i32
  }
  func.func @transform_1(%arg0: i32) -> (i32, i32) {
    %c0_i32 = arith.constant 0 : i32
    %c0_i32_0 = arith.constant 0 : i32
    %c0_i32_1 = arith.constant 0 : i32
    return %c0_i32, %c0_i32_0 : i32, i32
  }
  func.func @transform_2(%arg0: i32) -> (i32, i32) {
    %c0_i32 = arith.constant 0 : i32
    %c0_i32_0 = arith.constant 0 : i32
    %c0_i32_1 = arith.constant 0 : i32
    return %c0_i32, %c0_i32_0 : i32, i32
  }
  func.func @transform_3(%arg0: i32) -> (i32, i32) {
    %c0_i32 = arith.constant 0 : i32
    %c0_i32_0 = arith.constant 0 : i32
    %c0_i32_1 = arith.constant 0 : i32
    return %c0_i32, %c0_i32_0 : i32, i32
  }
  func.func @transform_4(%arg0: i32) -> (i32, i32) {
    %c0_i32 = arith.constant 0 : i32
    %c0_i32_0 = arith.constant 0 : i32
    %c0_i32_1 = arith.constant 0 : i32
    return %c0_i32, %c0_i32_0 : i32, i32
  }
  func.func @transform_5(%arg0: i32) -> (i32, i32) {
    %c0_i32 = arith.constant 0 : i32
    %c0_i32_0 = arith.constant 0 : i32
    %c0_i32_1 = arith.constant 0 : i32
    return %c0_i32, %c0_i32_0 : i32, i32
  }
  func.func @transform_6(%arg0: i32) -> (i32, i32) {
    %c0_i32 = arith.constant 0 : i32
    %c0_i32_0 = arith.constant 0 : i32
    %c0_i32_1 = arith.constant 0 : i32
    return %c0_i32, %c0_i32_0 : i32, i32
  }
  func.func @transform_7(%arg0: i32) -> (i32, i32) {
    %c0_i32 = arith.constant 0 : i32
    %c0_i32_0 = arith.constant 0 : i32
    %c0_i32_1 = arith.constant 0 : i32
    return %c0_i32, %c0_i32_0 : i32, i32
  }
  func.func @transform_8(%arg0: i32) -> (i32, i32) {
    %c0_i32 = arith.constant 0 : i32
    %c0_i32_0 = arith.constant 0 : i32
    %c0_i32_1 = arith.constant 0 : i32
    return %c0_i32, %c0_i32_0 : i32, i32
  }
}

</mosaic_0001>

<bundles_post_ra>
// kernel: residual_block.1
= control target key start
LH: loop header
LB: loop body
LE: loop exit
PB: predicated region body
PF: predicated region fallthrough
CT: control target
= control target key end

     0   :  { %v123_v0 = vlaneseq  ;;  %s4737_s9 = smov 17   ;;  %s4738_s18 = smov 16   ;;  %vm180_vm0 = vcmask 138240   ;;  %vm255_vm1 = vcmask 130048   ;;  %vm330_vm2 = vcmask 121856   ;;  %s6715_s1 = inlined_call_operand.vmem [shape: f32[9,512], index: 1, kind: input, shape index: {}]   ;;  %s6716_s0 = inlined_call_operand.vmem [shape: f32[8,512], index: 0, kind: input, shape index: {}]   ;;  %s6717_s2 = inlined_call_operand.vmem [shape: f32[8,128], index: 2, kind: input, shape index: {}]   ;;  %s6718_s4 = inlined_call_operand.vmem [shape: f32[8,1], index: 4, kind: input, shape index: {}]   ;;  %s6719_s3 = inlined_call_operand.vmem [shape: f32[8,1], index: 3, kind: input, shape index: {}]   ;;  %s6720_s5 = inlined_call_operand.vmem [shape: f32[8,128], index: 5, kind: input, shape index: {}]   ;;  %s6721_s7 = inlined_call_operand.vmem [shape: f32[8,1], index: 7, kind: input, shape index: {}]   ;;  %s6722_s6 = inlined_call_operand.vmem [shape: f32[8,1], index: 6, kind: input, shape index: {}]   ;;  %s6723_s8 = inlined_call_operand.vmem [shape: f32[8,512], index: 8, kind: output, shape index: {}]  }
   0x1   :  { %v4713_v1 = vld [vmem:[%s6715_s1 + $0x20] ss:$0 sm:$0xff]  ;;  %v4715_v2 = vld [vmem:[%s6715_s1 + $0x30] ss:$0 sm:$0xff]  ;;  %v4714_v4 = vld [vmem:[%s6715_s1 + $0x28] ss:$0 sm:$0xff] }
   0x2   :  { %690 = vrot.lane.b32.xlu0 %v4713_v1, %s4737_s9  ;;  %694 = vrot.lane.b32.xlu1 %v4715_v2, %s4737_s9  ;;  %v4800_v3 = vshrl.u32 %v123_v0, 7  ;;  %v4808_v5 = vld [vmem:[%s6715_s1] sm:$0xff]  ;;  %v4813_v6 = vld [vmem:[%s6715_s1 + $0x8] sm:$0xff]  ;;  %s4739_s19 = smov 15   ;;  %s4740_s20 = smov 1   ;;  %vm405_vm3 = vcmask 7168  }
   0x3   :  { %v4821_v8 = vld [vmem:[%s6715_s1 + $0x10] sm:$0xff]  ;;  %s4741_s21 = smov 127   ;;  %s4742_s22 = smov 113   ;;  %v4876_v36 = vld [vmem:[%s6715_s1 + $0x18] sm:$0xff]  ;;  %v4902_v45 = vld [vmem:[%s6716_s0] sm:$0xff]  ;;  %vm376_vm4 = vcmask 1039360  }
   0x4   :  { %v4816_v7 = vsub.s32 7, %v4800_v3  ;;  %v526_v11 = vsub.s32 6, %v4800_v3  ;;  %v453_v15 = vsub.s32 5, %v4800_v3  ;;  %v350_v19 = vsub.s32 3, %v4800_v3  ;;  %s4743_s23 = smov 112   ;;  %s4744_s24 = smov 111  }
   0x5   :  { %v275_v23 = vsub.s32 2, %v4800_v3  ;;  %v200_v27 = vsub.s32 1, %v4800_v3  ;;  %v125_v31 = vsub.s32 0, %v4800_v3  ;;  %v4716_v37 = vld [vmem:[%s6715_s1 + $0x38] ss:$0 sm:$0xff]  ;;  %v4914_v49 = vld [vmem:[%s6716_s0 + $0x10] sm:$0xff] }
   0x6   :  { %692 = vrot.lane.b32.xlu0 %v4714_v4, %s4737_s9  ;;  %v600_v9 = vrot.slane %v4808_v5, %v4816_v7  ;;  %v604_v10 = vrot.slane %v4813_v6, %v4816_v7  ;;  %v608_v12 = vrot.slane %v4821_v8, %v4816_v7  ;;  %v527_v13 = vrot.slane %v4808_v5, %v526_v11  ;;  %v4919_v50 = vld [vmem:[%s6716_s0 + $0x8] sm:$0xff] }
   0x7   :  { %v531_v14 = vrot.slane %v4813_v6, %v526_v11  ;;  %v535_v16 = vrot.slane %v4821_v8, %v526_v11  ;;  %v454_v17 = vrot.slane %v4808_v5, %v453_v15  ;;  %v458_v18 = vrot.slane %v4813_v6, %v453_v15 }
   0x8   :  { %617 = vrot.lane.b32.xlu1 %v600_v9, %s4738_s18  ;;  %v462_v20 = vrot.slane %v4821_v8, %v453_v15  ;;  %v351_v21 = vrot.slane %v4808_v5, %v350_v19  ;;  %v355_v22 = vrot.slane %v4813_v6, %v350_v19  ;;  %v359_v24 = vrot.slane %v4821_v8, %v350_v19 }
   0x9   :  { %v276_v25 = vrot.slane %v4808_v5, %v275_v23  ;;  %v280_v26 = vrot.slane %v4813_v6, %v275_v23  ;;  %v284_v28 = vrot.slane %v4821_v8, %v275_v23  ;;  %v201_v29 = vrot.slane %v4808_v5, %v200_v27 }
   0xa   :  { %619 = vrot.lane.b32.xlu0 %v604_v10, %s4738_s18  ;;  %v205_v30 = vrot.slane %v4813_v6, %v200_v27  ;;  %v209_v32 = vrot.slane %v4821_v8, %v200_v27  ;;  %v126_v33 = vrot.slane %v4808_v5, %v125_v31  ;;  %v130_v34 = vrot.slane %v4813_v6, %v125_v31 }
   0xb   :  { %v134_v35 = vrot.slane %v4821_v8, %v125_v31  ;;  %v612_v38 = vrot.slane %v4876_v36, %v4816_v7  ;;  %v539_v39 = vrot.slane %v4876_v36, %v526_v11  ;;  %v466_v40 = vrot.slane %v4876_v36, %v453_v15 }
   0xc   :  { %621 = vrot.lane.b32.xlu1 %v608_v12, %s4738_s18  ;;  %v363_v41 = vrot.slane %v4876_v36, %v350_v19  ;;  %v288_v42 = vrot.slane %v4876_v36, %v275_v23  ;;  %v213_v43 = vrot.slane %v4876_v36, %v200_v27  ;;  %v138_v44 = vrot.slane %v4876_v36, %v125_v31 }
   0xd   :  { %vm301_vm5 = vcmask 924672   ;;  %vm226_vm6 = vcmask 916480   ;;  %vm151_vm7 = vcmask 908288  }
   0xe   :  { %544 = vrot.lane.b32.xlu0 %v527_v13, %s4739_s19 }
  0x10   :  { %546 = vrot.lane.b32.xlu1 %v531_v14, %s4739_s19 }
  0x12   :  { %548 = vrot.lane.b32.xlu0 %v535_v16, %s4739_s19 }
  0x14   :  { %471 = vrot.lane.b32.xlu1 %v454_v17, %s4740_s20 }
  0x16   :  { %473 = vrot.lane.b32.xlu0 %v458_v18, %s4740_s20 }
  0x18   :  { %475 = vrot.lane.b32.xlu1 %v462_v20, %s4740_s20 }
  0x1a   :  { %368 = vrot.lane.b32.xlu0 %v351_v21, %s4741_s21 }
  0x1c   :  { %370 = vrot.lane.b32.xlu1 %v355_v22, %s4741_s21 }
  0x1e   :  { %372 = vrot.lane.b32.xlu0 %v359_v24, %s4741_s21 }
  0x20   :  { %293 = vrot.lane.b32.xlu1 %v276_v25, %s4742_s22 }
  0x22   :  { %295 = vrot.lane.b32.xlu0 %v280_v26, %s4742_s22 }
  0x24   :  { %297 = vrot.lane.b32.xlu1 %v284_v28, %s4742_s22 }
  0x26   :  { %218 = vrot.lane.b32.xlu0 %v201_v29, %s4743_s23 }
  0x28   :  { %220 = vrot.lane.b32.xlu1 %v205_v30, %s4743_s23 }
  0x2a   :  { %222 = vrot.lane.b32.xlu0 %v209_v32, %s4743_s23 }
  0x2c   :  { %143 = vrot.lane.b32.xlu1 %v126_v33, %s4744_s24 }
  0x2e   :  { %145 = vrot.lane.b32.xlu0 %v130_v34, %s4744_s24 }
  0x30   :  { %147 = vrot.lane.b32.xlu1 %v134_v35, %s4744_s24 }
  0x32   :  { %696 = vrot.lane.b32.xlu0 %v4716_v37, %s4737_s9 }
  0x34   :  { %623 = vrot.lane.b32.xlu1 %v612_v38, %s4738_s18 }
  0x36   :  { %550 = vrot.lane.b32.xlu0 %v539_v39, %s4739_s19 }
  0x38   :  { %477 = vrot.lane.b32.xlu1 %v466_v40, %s4740_s20 }
  0x3c   :  { %374 = vrot.lane.b32.xlu1 %v363_v41, %s4741_s21 }
  0x40   :  { %299 = vrot.lane.b32.xlu1 %v288_v42, %s4742_s22 }
  0x44   :  { %224 = vrot.lane.b32.xlu1 %v213_v43, %s4743_s23 }
  0x48   :  { %149 = vrot.lane.b32.xlu1 %v138_v44, %s4744_s24 }
  0x74   :  { %v4904_v46 = vpop.permute.xlu0 %690  ;;  %v4906_v47 = vpop.permute.xlu1 %694 }
  0x75   :  { %6816 = vst [vmem:[#allocation4_spill] sm:$0xff] %v4904_v46  ;;  %v706_v48 = vmul.f32 %v4904_v46, %v4902_v45 }
  0x77   :  { %716 = vrot.lane.b32.xlu0 %v706_v48, %s4744_s24 }
  0x78   :  { %v693_v51 = vpop.permute.xlu0 %692 }
  0x79   :  { %v4923_v52 = vsel %vm180_vm0, %v4904_v46, %v693_v51  ;;  %v4927_v53 = vsel %vm180_vm0, %v693_v51, %v4906_v47 }
  0x7a   :  { %6817 = vst [vmem:[#allocation5_spill] sm:$0xff] %v4923_v52  ;;  %6818 = vst [vmem:[#allocation6_spill] sm:$0xff] %v4927_v53  ;;  %v4929_v54 = vpop.permute.xlu1 %617  ;;  %v708_v55 = vmul.f32 %v4927_v53, %v4914_v49  ;;  %v707_v56 = vmul.f32 %v4923_v52, %v4919_v50 }
  0x7b   :  { %6819 = vst [vmem:[#allocation7_spill] sm:$0xff] %v4929_v54  ;;  %v633_v58 = vmul.f32 %v4929_v54, %v4902_v45 }
  0x7c   :  { %v620_v57 = vpop.permute.xlu0 %619  ;;  %720 = vrot.lane.b32.xlu1 %v708_v55, %s4744_s24  ;;  %718 = vrot.lane.b32.xlu0 %v707_v56, %s4744_s24 }
  0x7d   :  { %v4966_v14 = vsel %vm255_vm1, %v4929_v54, %v620_v57 }
  0x7e   :  { %v4939_v59 = vpop.permute.xlu1 %621  ;;  %6824 = vst [vmem:[#allocation12_spill] sm:$0xff] %v4966_v14  ;;  %v634_v16 = vmul.f32 %v4966_v14, %v4919_v50 }
  0x7f   :  { %v4983_v21 = vsel %vm255_vm1, %v620_v57, %v4939_v59  ;;  %v6724_v57 = vmov 0.0  }
  0x80   :  { %v4941_v60 = vpop.permute.xlu0 %544  ;;  %643 = vrot.lane.b32.xlu0 %v633_v58, %s4743_s23  ;;  %6827 = vst [vmem:[#allocation15_spill] sm:$0xff] %v4983_v21  ;;  %v635_v24 = vmul.f32 %v4983_v21, %v4914_v49  ;;  %898 = vmatprep.mubr.f32.mxu0 %v6724_v57 }
  0x81   :  { %6820 = vst [vmem:[#allocation8_spill] sm:$0xff] %v4941_v60  ;;  %v560_v61 = vmul.f32 %v4941_v60, %v4902_v45  ;;  %1134 = vmatprep.mubr.f32.mxu1 %v6724_v57  ;;  %v5203_v57 = vsub.s32 4, %v4800_v3 }
  0x82   :  { %v547_v62 = vpop.permute.xlu1 %546 }
  0x83   :  { %v4974_v17 = vsel %vm330_vm2, %v4941_v60, %v547_v62 }
  0x84   :  { %v4946_v63 = vpop.permute.xlu0 %548  ;;  %570 = vrot.lane.b32.xlu0 %v560_v61, %s4742_s22  ;;  %6825 = vst [vmem:[#allocation13_spill] sm:$0xff] %v4974_v17  ;;  %v561_v22 = vmul.f32 %v4974_v17, %v4919_v50 }
  0x85   :  { %v4998_v25 = vsel %vm330_vm2, %v547_v62, %v4946_v63 }
  0x86   :  { %v4949_v0 = vpop.permute.xlu1 %471  ;;  %6829 = vst [vmem:[#allocation17_spill] sm:$0xff] %v4998_v25  ;;  %v562_v29 = vmul.f32 %v4998_v25, %v4914_v49 }
  0x87   :  { %6821 = vst [vmem:[#allocation9_spill] sm:$0xff] %v4949_v0  ;;  %v487_v1 = vmul.f32 %v4949_v0, %v4902_v45 }
  0x88   :  { %v474_v2 = vpop.permute.xlu0 %473 }
  0x89   :  { %497 = vrot.lane.b32.xlu0 %v487_v1, %s4741_s21  ;;  %v4991_v23 = vsel %vm405_vm3, %v4949_v0, %v474_v2 }
  0x8a   :  { %v4954_v4 = vpop.permute.xlu1 %475  ;;  %6828 = vst [vmem:[#allocation16_spill] sm:$0xff] %v4991_v23  ;;  %v488_v27 = vmul.f32 %v4991_v23, %v4919_v50 }
  0x8b   :  { %v5012_v30 = vsel %vm405_vm3, %v474_v2, %v4954_v4 }
  0x8c   :  { %v369_v7 = vpop.permute.xlu0 %368  ;;  %6831 = vst [vmem:[#allocation19_spill] sm:$0xff] %v5012_v30  ;;  %v489_v35 = vmul.f32 %v5012_v30, %v4914_v49 }
  0x8d   :  { %v4956_v9 = vmul.f32 0.0, %v369_v7 }
  0x8e   :  { %v371_v10 = vpop.permute.xlu1 %370 }
  0x8f   :  { %6822 = vst [vmem:[#allocation10_spill] sm:$0xff] %v4956_v9  ;;  %395 = vrot.lane.b32.xlu0 %v4956_v9, %s4740_s20  ;;  %v5026_v37 = vsel %vm376_vm4, %v369_v7, %v371_v10 }
  0x90   :  { %v4960_v11 = vpop.permute.xlu0 %372  ;;  %6833 = vst [vmem:[#allocation21_spill] sm:$0xff] %v5026_v37  ;;  %v386_v42 = vmul.f32 %v5026_v37, %v4902_v45 }
  0x91   :  { %v5005_v28 = vsel %vm376_vm4, %v371_v10, %v4960_v11 }
  0x92   :  { %v294_v12 = vpop.permute.xlu1 %293  ;;  %6830 = vst [vmem:[#allocation18_spill] sm:$0xff] %v5005_v28  ;;  %v387_v32 = vmul.f32 %v5005_v28, %v4919_v50 }
  0x93   :  { %v4962_v13 = vmul.f32 0.0, %v294_v12 }
  0x94   :  { %v296_v15 = vpop.permute.xlu0 %295 }
  0x95   :  { %6823 = vst [vmem:[#allocation11_spill] sm:$0xff] %v4962_v13  ;;  %320 = vrot.lane.b32.xlu1 %v4962_v13, %s4739_s19  ;;  %v5020_v33 = vsel %vm301_vm5, %v294_v12, %v296_v15  ;;  %v5080_v12 = vld [vmem:[%s6716_s0 + $0x18] sm:$0xff] }
  0x96   :  { %v4976_v19 = vpop.permute.xlu1 %297  ;;  %6832 = vst [vmem:[#allocation20_spill] sm:$0xff] %v5020_v33  ;;  %v311_v39 = vmul.f32 %v5020_v33, %v4902_v45 }
  0x97   :  { %v5042_v43 = vsel %vm301_vm5, %v296_v15, %v4976_v19 }
  0x98   :  { %v219_v18 = vpop.permute.xlu0 %218  ;;  %6835 = vst [vmem:[#allocation23_spill] sm:$0xff] %v5042_v43  ;;  %v312_v55 = vmul.f32 %v5042_v43, %v4919_v50 }
  0x99   :  { %v4978_v20 = vmul.f32 0.0, %v219_v18  ;;  %645 = vrot.lane.b32.xlu1 %v634_v16, %s4743_s23 }
  0x9a   :  { %v221_v26 = vpop.permute.xlu1 %220 }
  0x9b   :  { %6826 = vst [vmem:[#allocation14_spill] sm:$0xff] %v4978_v20  ;;  %245 = vrot.lane.b32.xlu0 %v4978_v20, %s4738_s18  ;;  %v5056_v56 = vsel %vm226_vm6, %v219_v18, %v221_v26 }
  0x9c   :  { %v5014_v31 = vpop.permute.xlu0 %222  ;;  %6837 = vst [vmem:[#allocation25_spill] sm:$0xff] %v5056_v56  ;;  %v236_v61 = vmul.f32 %v5056_v56, %v4902_v45 }
  0x9d   :  { %572 = vrot.lane.b32.xlu1 %v561_v22, %s4742_s22  ;;  %v5030_v38 = vsel %vm226_vm6, %v221_v26, %v5014_v31 }
  0x9e   :  { %v144_v34 = vpop.permute.xlu1 %143  ;;  %6834 = vst [vmem:[#allocation22_spill] sm:$0xff] %v5030_v38  ;;  %v237_v40 = vmul.f32 %v5030_v38, %v4919_v50 }
  0x9f   :  { %647 = vrot.lane.b32.xlu0 %v635_v24, %s4743_s23  ;;  %v5068_v1 = vmul.f32 0.0, %v144_v34 }
  0xa0   :  { %v146_v41 = vpop.permute.xlu0 %145 }
  0xa1   :  { %499 = vrot.lane.b32.xlu1 %v488_v27, %s4741_s21  ;;  %v5045_v44 = vsel %vm151_vm7, %v144_v34, %v146_v41  ;;  %6839 = vst [vmem:[#allocation27_spill] sm:$0xff] %v5068_v1 }
  0xa2   :  { %6836 = vst [vmem:[#allocation24_spill] sm:$0xff] %v5045_v44  ;;  %v5047_v48 = vpop.permute.xlu1 %147  ;;  %v161_v51 = vmul.f32 %v5045_v44, %v4902_v45 }
  0xa3   :  { %574 = vrot.lane.b32.xlu0 %v562_v29, %s4742_s22  ;;  %v5066_v62 = vsel %vm151_vm7, %v146_v41, %v5047_v48 }
  0xa4   :  { %6838 = vst [vmem:[#allocation26_spill] sm:$0xff] %v5066_v62  ;;  %v697_v2 = vpop.permute.xlu0 %696  ;;  %v162_v10 = vmul.f32 %v5066_v62, %v4919_v50 }
  0xa5   :  { %399 = vrot.lane.b32.xlu1 %v387_v32, %s4740_s20  ;;  %v5071_v7 = vmul.f32 0.0, %v697_v2  ;;  %v5084_v15 = vsel %vm180_vm0, %v4906_v47, %v697_v2 }
  0xa6   :  { %v624_v58 = vpop.permute.xlu1 %623  ;;  %6841 = vst [vmem:[#allocation29_spill] sm:$0xff] %v5084_v15  ;;  %v709_v18 = vmul.f32 %v5084_v15, %v5080_v12 }
  0xa7   :  { %501 = vrot.lane.b32.xlu0 %v489_v35, %s4741_s21  ;;  %6840 = vst [vmem:[#allocation28_spill] sm:$0xff] %v5071_v7  ;;  %v5089_v22 = vmul.f32 0.0, %v624_v58  ;;  %v5095_v24 = vsel %vm255_vm1, %v4939_v59, %v624_v58 }
  0xa8   :  { %6843 = vst [vmem:[#allocation31_spill] sm:$0xff] %v5095_v24  ;;  %v551_v26 = vpop.permute.xlu0 %550  ;;  %v636_v29 = vmul.f32 %v5095_v24, %v5080_v12 }
  0xa9   :  { %322 = vrot.lane.b32.xlu1 %v311_v39, %s4739_s19  ;;  %6842 = vst [vmem:[#allocation30_spill] sm:$0xff] %v5089_v22  ;;  %v5098_v47 = vmul.f32 0.0, %v551_v26  ;;  %v5108_v32 = vsel %vm330_vm2, %v4946_v63, %v551_v26 }
  0xaa   :  { %v478_v16 = vpop.permute.xlu1 %477  ;;  %6846 = vst [vmem:[#allocation34_spill] sm:$0xff] %v5108_v32  ;;  %v563_v59 = vmul.f32 %v5108_v32, %v5080_v12 }
  0xab   :  { %397 = vrot.lane.b32.xlu0 %v386_v42, %s4740_s20  ;;  %6844 = vst [vmem:[#allocation32_spill] sm:$0xff] %v5098_v47  ;;  %v5113_v34 = vmul.f32 0.0, %v478_v16  ;;  %v5119_v35 = vsel %vm405_vm3, %v4954_v4, %v478_v16 }
  0xac   :  { %6848 = vst [vmem:[#allocation36_spill] sm:$0xff] %v5119_v35 }
  0xad   :  { %249 = vrot.lane.b32.xlu1 %v237_v40, %s4738_s18  ;;  %6847 = vst [vmem:[#allocation35_spill] sm:$0xff] %v5113_v34  ;;  %v490_v40 = vmul.f32 %v5119_v35, %v5080_v12 }
  0xae   :  { %v5100_v27 = vpop.permute.xlu1 %374 }
  0xaf   :  { %324 = vrot.lane.b32.xlu0 %v312_v55, %s4739_s19  ;;  %6845 = vst [vmem:[#allocation33_spill] sm:$0xff] %v5100_v27  ;;  %v389_v63 = vmul.f32 %v5100_v27, %v5080_v12  ;;  %v5133_v41 = vsel %vm376_vm4, %v4960_v11, %v5100_v27 }
  0xb0   :  { %6850 = vst [vmem:[#allocation38_spill] sm:$0xff] %v5133_v41 }
  0xb1   :  { %172 = vrot.lane.b32.xlu1 %v161_v51, %s4737_s9  ;;  %v388_v51 = vmul.f32 %v5133_v41, %v4914_v49 }
  0xb2   :  { %v5121_v39 = vpop.permute.xlu1 %299 }
  0xb3   :  { %247 = vrot.lane.b32.xlu0 %v236_v61, %s4738_s18  ;;  %6849 = vst [vmem:[#allocation37_spill] sm:$0xff] %v5121_v39  ;;  %v314_v4 = vmul.f32 %v5121_v39, %v5080_v12  ;;  %v5146_v55 = vsel %vm301_vm5, %v4976_v19, %v5121_v39  ;;  %v5207_v39 = vrot.slane %v4813_v6, %v5203_v57 }
  0xb4   :  { %6852 = vst [vmem:[#allocation40_spill] sm:$0xff] %v5146_v55  ;;  %v313_v58 = vmul.f32 %v5146_v55, %v4914_v49 }
  0xb5   :  { %170 = vrot.lane.b32.xlu1 %v5068_v1, %s4737_s9  ;;  %6856 = vst [vmem:[#allocation44_spill] sm:$0xff] %v5207_v39  ;;  %v439_v3 = vmul.f32 %v5207_v39, %v4919_v50 }
  0xb6   :  { %v5138_v42 = vpop.permute.xlu1 %224 }
  0xb7   :  { %174 = vrot.lane.b32.xlu0 %v162_v10, %s4737_s9  ;;  %6851 = vst [vmem:[#allocation39_spill] sm:$0xff] %v5138_v42  ;;  %v239_v11 = vmul.f32 %v5138_v42, %v5080_v12  ;;  %v5157_v61 = vsel %vm226_vm6, %v5014_v31, %v5138_v42 }
  0xb8   :  { %6853 = vst [vmem:[#allocation41_spill] sm:$0xff] %v5157_v61  ;;  %v238_v10 = vmul.f32 %v5157_v61, %v4914_v49 }
  0xb9   :  { %724 = vrot.lane.b32.xlu1 %v5071_v7, %s4744_s24 }
  0xba   :  { %v5159_v2 = vpop.permute.xlu1 %149 }
  0xbb   :  { %722 = vrot.lane.b32.xlu0 %v709_v18, %s4744_s24  ;;  %6854 = vst [vmem:[#allocation42_spill] sm:$0xff] %v5159_v2  ;;  %v164_v19 = vmul.f32 %v5159_v2, %v5080_v12  ;;  %v5170_v16 = vsel %vm151_vm7, %v5047_v48, %v5159_v2 }
  0xbc   :  { %6855 = vst [vmem:[#allocation43_spill] sm:$0xff] %v5170_v16  ;;  %v163_v31 = vmul.f32 %v5170_v16, %v4914_v49 }
  0xbd   :  { %651 = vrot.lane.b32.xlu1 %v5089_v22, %s4743_s23  ;;  %v5232_v22 = vand.u32 4294901760, %v439_v3 }
  0xbf   :  { %649 = vrot.lane.b32.xlu0 %v636_v29, %s4743_s23 }
  0xc1   :  { %578 = vrot.lane.b32.xlu1 %v5098_v47, %s4742_s22 }
  0xc3   :  { %576 = vrot.lane.b32.xlu0 %v563_v59, %s4742_s22 }
  0xc5   :  { %505 = vrot.lane.b32.xlu1 %v5113_v34, %s4741_s21 }
  0xc7   :  { %503 = vrot.lane.b32.xlu0 %v490_v40, %s4741_s21 }
  0xc9   :  { %403 = vrot.lane.b32.xlu1 %v389_v63, %s4740_s20 }
  0xcb   :  { %401 = vrot.lane.b32.xlu0 %v388_v51, %s4740_s20 }
  0xcd   :  { %328 = vrot.lane.b32.xlu1 %v314_v4, %s4739_s19 }
  0xcf   :  { %326 = vrot.lane.b32.xlu0 %v313_v58, %s4739_s19 }
  0xd1   :  { %253 = vrot.lane.b32.xlu1 %v239_v11, %s4738_s18 }
  0xd3   :  { %251 = vrot.lane.b32.xlu0 %v238_v10, %s4738_s18 }
  0xd5   :  { %178 = vrot.lane.b32.xlu1 %v164_v19, %s4737_s9 }
  0xd7   :  { %176 = vrot.lane.b32.xlu0 %v163_v31, %s4737_s9 }
  0xe9   :  { %v717_v18 = vpop.permute.xlu0 %716 }
  0xee   :  { %v5177_v26 = vpop.permute.xlu1 %720  ;;  %v719_v29 = vpop.permute.xlu0 %718 }
  0xef   :  { %v726_v59 = vsel %vm151_vm7, %v717_v18, %v719_v29  ;;  %v727_v63 = vsel %vm151_vm7, %v719_v29, %v5177_v26 }
  0xf0   :  { %v5182_v48 = vand.u32 4294901760, %v727_v63  ;;  %v5184_v40 = vand.u32 4294901760, %v726_v59 }
  0xf2   :  { %v5187_v4 = vsub.f32 %v727_v63, %v5182_v48  ;;  %v5190_v51 = vsub.f32 %v726_v59, %v5184_v40  ;;  %831 = vmatprep.subr.mxu0 %v5182_v48  ;;  %v644_v29 = vpop.permute.xlu0 %643 }
  0xf3   :  { %833 = vmatpush1.msra.mxu0 %v5184_v40 }
  0xf4   :  { %v6729_v11 = vand.u32 4294901760, %v5187_v4  ;;  %v6730_v58 = vand.u32 4294901760, %v5190_v51 }
  0xf6   :  { %v997_v19 = vsub.f32 %v5187_v4, %v6729_v11  ;;  %v1003_v10 = vsub.f32 %v5190_v51, %v6730_v58  ;;  %v571_v59 = vpop.permute.xlu0 %570  ;;  %v5211_v58 = vrot.slane %v4808_v5, %v5203_v57 }
  0xf8   :  { %v998_v31 = vand.u32 4294901760, %v997_v19  ;;  %v1004_v18 = vand.u32 4294901760, %v1003_v10  ;;  %6857 = vst [vmem:[#allocation45_spill] sm:$0xff] %v5211_v58  ;;  %v438_v27 = vmul.f32 %v5211_v58, %v4902_v45 }
  0xfa   :  { %999 = vmatprep.subr.mxu1 %v998_v31  ;;  %v5236_v39 = vand.u32 4294901760, %v438_v27 }
  0xfb   :  { %1005 = vmatpush1.msra.mxu1 %v1004_v18  ;;  %v498_v63 = vpop.permute.xlu0 %497 }
  0xfc   :  { %v5263_v61 = vsub.f32 %v438_v27, %v5236_v39 }
 0x101   :  { %v396_v42 = vpop.permute.xlu0 %395 }
 0x107   :  { %v321_v2 = vpop.permute.xlu1 %320 }
 0x10b   :  { %v646_v11 = vpop.permute.xlu1 %645 }
 0x10c   :  { %v653_v19 = vsel %vm226_vm6, %v644_v29, %v646_v11 }
 0x10d   :  { %v5214_v10 = vand.u32 4294901760, %v653_v19  ;;  %v5216_v31 = vpop.permute.xlu0 %245 }
 0x10f   :  { %v573_v18 = vpop.permute.xlu1 %572  ;;  %v5223_v6 = vsub.f32 %v653_v19, %v5214_v10 }
 0x110   :  { %v580_v34 = vsel %vm301_vm5, %v571_v59, %v573_v18 }
 0x111   :  { %v5226_v5 = vand.u32 4294901760, %v580_v34  ;;  %v5228_v47 = vpop.permute.xlu0 %647  ;;  %v6858_v44 = vand.u32 4294901760, %v5223_v6 }
 0x112   :  { %v654_v29 = vsel %vm226_vm6, %v646_v11, %v5228_v47 }
 0x113   :  { %v5234_v7 = vand.u32 4294901760, %v654_v29  ;;  %v500_v50 = vpop.permute.xlu1 %499  ;;  %v5239_v45 = vsub.f32 %v580_v34, %v5226_v5  ;;  %v5255_v34 = vsub.f32 %v439_v3, %v5232_v22  ;;  %v1015_v55 = vsub.f32 %v5223_v6, %v6858_v44  ;;  %v111_v44 = vld [vmem:[%s6717_s2] sm:$0xff] }
 0x114   :  { %v507_v19 = vsel %vm376_vm4, %v498_v63, %v500_v50 }
 0x115   :  { %v5244_v58 = vsub.f32 %v654_v29, %v5234_v7  ;;  %v5246_v16 = vand.u32 4294901760, %v507_v19  ;;  %835 = vmatprep.subr.mxu0 %v5234_v7  ;;  %v5249_v11 = vpop.permute.xlu0 %574  ;;  %v1016_v24 = vand.u32 4294901760, %v1015_v55  ;;  %v6859_v0 = vand.u32 4294901760, %v5239_v45 }
 0x116   :  { %v581_v1 = vsel %vm301_vm5, %v573_v18, %v5249_v11  ;;  %837 = vmatpush1.msra.mxu0 %v5214_v10 }
 0x117   :  { %v5257_v63 = vand.u32 4294901760, %v581_v1  ;;  %v5259_v59 = vpop.permute.xlu1 %399  ;;  %v6749_v29 = vand.u32 4294901760, %v5244_v58  ;;  %v5270_v41 = vsub.f32 %v507_v19, %v5246_v16  ;;  %v1027_v15 = vsub.f32 %v5239_v45, %v6859_v0 }
 0x119   :  { %v5273_v3 = vsub.f32 %v581_v1, %v5257_v63  ;;  %839 = vmatprep.subr.mxu0 %v5257_v63  ;;  %v5276_v38 = vpop.permute.xlu0 %501  ;;  %v1009_v27 = vsub.f32 %v5244_v58, %v6749_v29 }
 0x11a   :  { %v508_v18 = vsel %vm376_vm4, %v500_v50, %v5276_v38  ;;  %841 = vmatpush1.msra.mxu0 %v5226_v5  ;;  %v5296_v50 = vand.u32 4294901760, %v111_v44 }
 0x11b   :  { %v5288_v19 = vand.u32 4294901760, %v508_v18  ;;  %v323_v35 = vpop.permute.xlu1 %322  ;;  %v1010_v33 = vand.u32 4294901760, %v1009_v27  ;;  %v6756_v32 = vand.u32 4294901760, %v5273_v3 }
 0x11c   :  { %v331_v29 = vsel %vm330_vm2, %v321_v2, %v323_v35  ;;  %v5331_v54 = vsub.f32 %v111_v44, %v5296_v50 }
 0x11d   :  { %v5299_v23 = vsub.f32 %v508_v18, %v5288_v19  ;;  %v5301_v1 = vand.u32 4294901760, %v331_v29  ;;  %843 = vmatprep.subr.mxu0 %v5288_v19  ;;  %1011 = vmatprep.subr.mxu1 %v1010_v33  ;;  %v398_v27 = vpop.permute.xlu0 %397  ;;  %v1021_v2 = vsub.f32 %v5273_v3, %v6756_v32  ;;  %v6860_v18 = vand.u32 4294901760, %v5255_v34 }
 0x11e   :  { %v406_v28 = vsel %vm405_vm3, %v396_v42, %v398_v27  ;;  %v407_v0 = vsel %vm405_vm3, %v398_v27, %v5259_v59  ;;  %845 = vmatpush1.msra.mxu0 %v5246_v16  ;;  %1017 = vmatpush1.msra.mxu1 %v1016_v24  ;;  %v6861_v42 = vand.u32 4294901760, %v5263_v61  ;;  %v1028_v24 = vand.u32 4294901760, %v1027_v15  ;;  %6862 = vst [vmem:[#allocation46_spill] sm:$0xff] %v5331_v54 }
 0x11f   :  { %v1045_v62 = vsub.f32 %v5255_v34, %v6860_v18  ;;  %v5315_v33 = vand.u32 4294901760, %v407_v0  ;;  %v5317_v25 = vand.u32 4294901760, %v406_v28  ;;  %847 = vmatprep.subr.mxu0 %v5232_v22  ;;  %v5320_v32 = vpop.permute.xlu1 %249  ;;  %v1022_v55 = vand.u32 4294901760, %v1021_v2 }
 0x120   :  { %v1051_v27 = vsub.f32 %v5263_v61, %v6861_v42  ;;  %v5326_v56 = vsub.f32 %v331_v29, %v5301_v1  ;;  %849 = vmatpush1.msra.mxu0 %v5236_v39  ;;  %v6863_v29 = vand.u32 4294901760, %v5270_v41  ;;  %v6864_v44 = vand.u32 4294901760, %v5299_v23 }
 0x121   :  { %v5334_v43 = vsub.f32 %v407_v0, %v5315_v33  ;;  %v5337_v2 = vsub.f32 %v406_v28, %v5317_v25  ;;  %851 = vmatprep.subr.mxu0 %v5315_v33  ;;  %1023 = vmatprep.subr.mxu1 %v1022_v55  ;;  %v5340_v42 = vpop.permute.xlu0 %324  ;;  %v1046_v55 = vand.u32 4294901760, %v1045_v62 }
 0x122   :  { %v1039_v15 = vsub.f32 %v5270_v41, %v6863_v29  ;;  %v332_v18 = vsel %vm330_vm2, %v323_v35, %v5340_v42  ;;  %853 = vmatpush1.msra.mxu0 %v5317_v25  ;;  %1029 = vmatpush1.msra.mxu1 %v1028_v24  ;;  %v1033_v28 = vsub.f32 %v5299_v23, %v6864_v44  ;;  %v1052_v29 = vand.u32 4294901760, %v1051_v27 }
 0x123   :  { %v5351_v0 = vand.u32 4294901760, %v332_v18  ;;  %v173_v21 = vpop.permute.xlu1 %172  ;;  %v6767_v37 = vand.u32 4294901760, %v5334_v43  ;;  %v6769_v14 = vand.u32 4294901760, %v5337_v2  ;;  %v5357_v35 = vand.u32 4294901760, %v5331_v54 }
 0x124   :  { %v1034_v30 = vand.u32 4294901760, %v1033_v28  ;;  %v1040_v60 = vand.u32 4294901760, %v1039_v15 }
 0x125   :  { %v5360_v24 = vsub.f32 %v332_v18, %v5351_v0  ;;  %855 = vmatprep.subr.mxu0 %v5351_v0  ;;  %v248_v44 = vpop.permute.xlu0 %247  ;;  %v1057_v62 = vsub.f32 %v5334_v43, %v6767_v37  ;;  %v1063_v27 = vsub.f32 %v5337_v2, %v6769_v14 }
 0x126   :  { %1035 = vmatprep.subr.mxu1 %v1034_v30  ;;  %v256_v28 = vsel %vm255_vm1, %v5216_v31, %v248_v44  ;;  %v257_v18 = vsel %vm255_vm1, %v248_v44, %v5320_v32  ;;  %857 = vmatpush1.msra.mxu0 %v5301_v1  ;;  %v6865_v31 = vand.u32 4294901760, %v5326_v56  ;;  %v902_v44 = vsub.f32 %v5331_v54, %v5357_v35 }
 0x127   :  { %v5374_v46 = vand.u32 4294901760, %v257_v18  ;;  %v5376_v15 = vand.u32 4294901760, %v256_v28  ;;  %1041 = vmatpush1.msra.mxu1 %v1040_v60  ;;  %v171_v53 = vpop.permute.xlu1 %170  ;;  %v1058_v37 = vand.u32 4294901760, %v1057_v62  ;;  %v1064_v17 = vand.u32 4294901760, %v1063_v27 }
 0x128   :  { %1047 = vmatprep.subr.mxu1 %v1046_v55  ;;  %v181_v14 = vsel %vm180_vm0, %v171_v53, %v173_v21  ;;  %v6774_v30 = vand.u32 4294901760, %v5360_v24  ;;  %v1075_v52 = vsub.f32 %v5326_v56, %v6865_v31  ;;  %v5409_v13 = vand.u32 4294901760, %v902_v44 }
 0x129   :  { %v5386_v20 = vsub.f32 %v257_v18, %v5374_v46  ;;  %v5389_v60 = vsub.f32 %v256_v28, %v5376_v15  ;;  %v5391_v62 = vand.u32 4294901760, %v181_v14  ;;  %1053 = vmatpush1.msra.mxu1 %v1052_v29  ;;  %859 = vmatprep.subr.mxu0 %v5374_v46  ;;  %v5394_v53 = vpop.permute.xlu0 %174 }
 0x12a   :  { %6866 = vst [vmem:[#allocation47_spill] sm:$0xff] %v5394_v53  ;;  %1059 = vmatprep.subr.mxu1 %v1058_v37  ;;  %v182_v55 = vsel %vm180_vm0, %v173_v21, %v5394_v53  ;;  %861 = vmatpush1.msra.mxu0 %v5376_v15  ;;  %v1069_v27 = vsub.f32 %v5360_v24, %v6774_v30  ;;  %v1076_v9 = vand.u32 4294901760, %v1075_v52  ;;  %6867 = vst [vmem:[#allocation48_spill] sm:$0xff] %v5409_v13 }
 0x12b   :  { %v5403_v28 = vsub.f32 %v181_v14, %v5391_v62  ;;  %v5405_v18 = vand.u32 4294901760, %v182_v55  ;;  %1065 = vmatpush1.msra.mxu1 %v1064_v17  ;;  %v6775_v29 = vand.u32 4294901760, %v5386_v20  ;;  %v6776_v31 = vand.u32 4294901760, %v5389_v60  ;;  %v725_v44 = vpop.permute.xlu1 %724 }
 0x12c   :  { %v1070_v37 = vand.u32 4294901760, %v1069_v27  ;;  %v6871_v53 = vand.u32 4294901760, %v5244_v58 }
 0x12d   :  { %v5412_v21 = vsub.f32 %v182_v55, %v5405_v18  ;;  %863 = vmatprep.subr.mxu0 %v5405_v18  ;;  %v1081_v14 = vsub.f32 %v5386_v20, %v6775_v29  ;;  %v1087_v17 = vsub.f32 %v5389_v60, %v6776_v31  ;;  %v6777_v30 = vand.u32 4294901760, %v5403_v28  ;;  %v5423_v52 = vpop.permute.xlu0 %722 }
 0x12e   :  { %1071 = vmatprep.subr.mxu1 %v1070_v37  ;;  %865 = vmatpush1.msra.mxu0 %v5391_v62 }
 0x12f   :  { %1077 = vmatpush1.msra.mxu1 %v1076_v9  ;;  %1186 = vmatprep.subr.mxu0 %v5187_v4  ;;  %v1082_v55 = vand.u32 4294901760, %v1081_v14  ;;  %v1088_v27 = vand.u32 4294901760, %v1087_v17  ;;  %v6778_v29 = vand.u32 4294901760, %v5412_v21  ;;  %v1099_v37 = vsub.f32 %v5403_v28, %v6777_v30 }
 0x130   :  { %904 = vmatmul.mubr.f32.vlgmr.msra.gmra.mxu0 %v5409_v13  ;;  %v6868_v14 = vmov 0.0   ;;  %v5476_v13 = vrot.slane %v4876_v36, %v5203_v57  ;;  %v6873_v36 = vand.u32 4294901760, %v5273_v3 }
 0x131   :  { %1189 = vmatpush1.msra.mxu0 %v5190_v51  ;;  %1083 = vmatprep.subr.mxu1 %v1082_v55  ;;  %v1093_v9 = vsub.f32 %v5412_v21, %v6778_v29  ;;  %v5439_v31 = vpop.permute.xlu0 %649  ;;  %v652_v55 = vpop.permute.xlu1 %651  ;;  %v1100_v30 = vand.u32 4294901760, %v1099_v37  ;;  %v6870_v29 = vand.u32 4294901760, %v5190_v51 }
 0x132   :  { %1192 = vmatprep.subr.mxu0 %v5244_v58  ;;  %1089 = vmatpush1.msra.mxu1 %v1088_v27  ;;  %v5495_v58 = vrot.slane %v4821_v8, %v5203_v57  ;;  %v6876_v8 = vand.u32 4294901760, %v5270_v41 }
 0x133   :  { %1195 = vmatpush1.msra.mxu0 %v5223_v6  ;;  %1270 = vmatprep.mubr.f32.mxu0 %v6868_v14  ;;  %v1094_v17 = vand.u32 4294901760, %v1093_v9 }
 0x134   :  { %1198 = vmatprep.subr.mxu0 %v5273_v3  ;;  %v728_v3 = vsel %vm151_vm7, %v5177_v26, %v5423_v52  ;;  %v440_v57 = vmul.f32 %v5495_v58, %v4914_v49 }
 0x135   :  { %1201 = vmatpush1.msra.mxu0 %v5239_v45  ;;  %1095 = vmatprep.subr.mxu1 %v1094_v17  ;;  %v5450_v27 = vpop.permute.xlu0 %576  ;;  %v579_v37 = vpop.permute.xlu1 %578  ;;  %v6869_v17 = vand.u32 4294901760, %v5187_v4  ;;  %v729_v4 = vsel %vm151_vm7, %v5423_v52, %v725_v44  ;;  %v6878_v44 = vand.u32 4294901760, %v5263_v61 }
 0x136   :  { %1204 = vmatprep.subr.mxu0 %v5299_v23  ;;  %1101 = vmatpush1.msra.mxu1 %v1100_v30 }
 0x137   :  { %1207 = vmatpush1.msra.mxu0 %v5270_v41  ;;  %1136 = vmatmul.mubr.f32.vlgmr.msra.gmra.mxu1 %v5296_v50 }
 0x138   :  { %1210 = vmatprep.subr.mxu0 %v5255_v34  ;;  %1308 = vmatprep.subr.mxu1 %v5182_v48 }
 0x139   :  { %1213 = vmatpush1.msra.mxu0 %v5263_v61  ;;  %1310 = vmatpush1.msra.mxu1 %v5184_v40  ;;  %v504_v30 = vpop.permute.xlu0 %503  ;;  %v506_v9 = vpop.permute.xlu1 %505  ;;  %v583_v61 = vsel %vm301_vm5, %v5450_v27, %v579_v37  ;;  %v6882_v37 = vand.u32 4294901760, %v5326_v56 }
 0x13a   :  { %1216 = vmatprep.subr.mxu0 %v5334_v43  ;;  %1312 = vmatprep.subr.mxu1 %v5234_v7 }
 0x13b   :  { %1219 = vmatpush1.msra.mxu0 %v5337_v2  ;;  %1314 = vmatpush1.msra.mxu1 %v5214_v10 }
 0x13c   :  { %1222 = vmatprep.subr.mxu0 %v5360_v24  ;;  %1316 = vmatprep.subr.mxu1 %v5257_v63 }
 0x13d   :  { %1225 = vmatpush1.msra.mxu0 %v5326_v56  ;;  %1318 = vmatpush1.msra.mxu1 %v5226_v5  ;;  %v5488_v51 = vpop.permute.xlu1 %403 }
 0x13e   :  { %1228 = vmatprep.subr.mxu0 %v5386_v20  ;;  %1320 = vmatprep.subr.mxu1 %v5288_v19 }
 0x13f   :  { %1231 = vmatpush1.msra.mxu0 %v5389_v60  ;;  %1322 = vmatpush1.msra.mxu1 %v5246_v16 }
 0x140   :  { %1234 = vmatprep.subr.mxu0 %v5412_v21  ;;  %1324 = vmatprep.subr.mxu1 %v5232_v22 }
 0x141   :  { %1237 = vmatpush1.msra.mxu0 %v5403_v28  ;;  %1326 = vmatpush1.msra.mxu1 %v5236_v39  ;;  %v329_v41 = vpop.permute.xlu1 %328 }
 0x142   :  { %1273 = vmatmul.mubr.f32.vlgmr.msra.gmra.mxu0 %v5331_v54  ;;  %1328 = vmatprep.subr.mxu1 %v5315_v33  ;;  %v6872_v54 = vand.u32 4294901760, %v5223_v6  ;;  %v441_v6 = vmul.f32 %v5476_v13, %v5080_v12  ;;  %v6877_v12 = vand.u32 4294901760, %v5255_v34  ;;  %v655_v34 = vsel %vm226_vm6, %v5228_v47, %v5439_v31 }
 0x143   :  { %1444 = vmatprep.subr.mxu0 %v6869_v17  ;;  %1330 = vmatpush1.msra.mxu1 %v5317_v25  ;;  %v5486_v17 = vpop.permute.xlu0 %401  ;;  %v582_v47 = vsel %vm301_vm5, %v5249_v11, %v5450_v27  ;;  %v5567_v11 = vand.u32 4294901760, %v583_v61 }
 0x144   :  { %1448 = vmatpush1.msra.mxu0 %v6870_v29  ;;  %1332 = vmatprep.subr.mxu1 %v5351_v0  ;;  %v5508_v29 = vand.u32 4294901760, %v729_v4  ;;  %v5522_v26 = vand.u32 4294901760, %v441_v6 }
 0x145   :  { %1452 = vmatprep.subr.mxu0 %v6871_v53  ;;  %1334 = vmatpush1.msra.mxu1 %v5301_v1  ;;  %v6875_v53 = vand.u32 4294901760, %v5299_v23  ;;  %v656_v23 = vsel %vm226_vm6, %v5439_v31, %v652_v55 }
 0x146   :  { %1456 = vmatpush1.msra.mxu0 %v6872_v54  ;;  %1336 = vmatprep.subr.mxu1 %v5374_v46  ;;  %v6874_v54 = vand.u32 4294901760, %v5239_v45  ;;  %v5524_v45 = vand.u32 4294901760, %v728_v3  ;;  %v5532_v49 = vsub.f32 %v729_v4, %v5508_v29  ;;  %v5540_v55 = vand.u32 4294901760, %v656_v23 }
 0x147   :  { %1460 = vmatprep.subr.mxu0 %v6873_v36  ;;  %1338 = vmatpush1.msra.mxu1 %v5376_v15  ;;  %v5526_v52 = vpop.permute.xlu0 %326  ;;  %v6880_v36 = vand.u32 4294901760, %v5337_v2  ;;  %v5561_v2 = vand.u32 4294901760, %v655_v34 }
 0x148   :  { %1464 = vmatpush1.msra.mxu0 %v6874_v54  ;;  %1340 = vmatprep.subr.mxu1 %v5405_v18  ;;  %v5559_v31 = vsub.f32 %v728_v3, %v5524_v45  ;;  %v1851_v27 = vand.u32 4294901760, %v5532_v49  ;;  %v5576_v4 = vsub.f32 %v656_v23, %v5540_v55  ;;  %v254_v54 = vpop.permute.xlu1 %253  ;;  %v6886_v3 = vand.u32 4294901760, %v5403_v28 }
 0x149   :  { %1468 = vmatprep.subr.mxu0 %v6875_v53  ;;  %1342 = vmatpush1.msra.mxu1 %v5391_v62  ;;  %v5594_v53 = vsub.f32 %v655_v34, %v5561_v2  ;;  %v408_v28 = vsel %vm405_vm3, %v5259_v59, %v5486_v17 }
 0x14a   :  { %1375 = vmatprep.mubr.f32.mxu1 %v6868_v14  ;;  %1472 = vmatpush1.msra.mxu0 %v6876_v8 }
 0x14b   :  { %1379 = vmatmul.mubr.f32.vlgmr.msra.gmra.mxu1 %v5357_v35  ;;  %1476 = vmatprep.subr.mxu0 %v6877_v12  ;;  %v252_v56 = vpop.permute.xlu0 %251  ;;  %v334_v12 = vsel %vm330_vm2, %v5526_v52, %v329_v41 }
 0x14c   :  { %1582 = vmatprep.subr.mxu1 %v5182_v48  ;;  %1480 = vmatpush1.msra.mxu0 %v6878_v44  ;;  %v6879_v48 = vand.u32 4294901760, %v5334_v43  ;;  %v6881_v43 = vand.u32 4294901760, %v5360_v24  ;;  %v6883_v24 = vand.u32 4294901760, %v5386_v20  ;;  %v179_v34 = vpop.permute.xlu1 %178 }
 0x14d   :  { %1584 = vmatpush1.msra.mxu1 %v5184_v40  ;;  %v5547_v40 = vand.u32 4294901760, %v440_v57  ;;  %1545 = vmatprep.mubr.f32.mxu0 %v6868_v14 }
 0x14e   :  { %1484 = vmatprep.subr.mxu0 %v6879_v48  ;;  %1586 = vmatprep.subr.mxu1 %v5234_v7  ;;  %v5556_v7 = vsub.f32 %v441_v6, %v5522_v26  ;;  %v1857_v6 = vand.u32 4294901760, %v5559_v31  ;;  %v5648_v48 = vand.u32 4294901760, %v408_v28 }
 0x14f   :  { %1488 = vmatpush1.msra.mxu0 %v6880_v36  ;;  %1588 = vmatpush1.msra.mxu1 %v5214_v10  ;;  %v510_v10 = vsel %vm376_vm4, %v504_v30, %v506_v9  ;;  %v5578_v9 = vand.u32 4294901760, %v582_v47  ;;  %v177_v41 = vpop.permute.xlu0 %176 }
 0x150   :  { %1492 = vmatprep.subr.mxu0 %v6881_v43  ;;  %1590 = vmatprep.subr.mxu1 %v5257_v63  ;;  %v509_v63 = vsel %vm376_vm4, %v5276_v38, %v504_v30  ;;  %v5584_v38 = vsub.f32 %v440_v57, %v5547_v40  ;;  %v5586_v20 = vand.u32 4294901760, %v510_v10  ;;  %v6782_v30 = vand.u32 4294901760, %v5556_v7 }
 0x151   :  { %1496 = vmatpush1.msra.mxu0 %v6882_v37  ;;  %1592 = vmatpush1.msra.mxu1 %v5226_v5  ;;  %v6884_v5 = vand.u32 4294901760, %v5389_v60  ;;  %v5596_v60 = vand.u32 4294901760, %v509_v63  ;;  %v5613_v8 = vsub.f32 %v582_v47, %v5578_v9  ;;  %v184_v37 = vsel %vm180_vm0, %v177_v41, %v179_v34 }
 0x152   :  { %1500 = vmatprep.subr.mxu0 %v6883_v24  ;;  %1594 = vmatprep.subr.mxu1 %v5288_v19  ;;  %v6885_v19 = vand.u32 4294901760, %v5412_v21  ;;  %v1852_v21 = vsub.f32 %v5532_v49, %v1851_v27  ;;  %v5623_v57 = vsub.f32 %v510_v10, %v5586_v20  ;;  %v5634_v59 = vsub.f32 %v5556_v7, %v6782_v30 }
 0x153   :  { %1504 = vmatpush1.msra.mxu0 %v6884_v5  ;;  %1596 = vmatpush1.msra.mxu1 %v5246_v16  ;;  %v409_v16 = vsel %vm405_vm3, %v5486_v17, %v5488_v51  ;;  %v1863_v51 = vand.u32 4294901760, %v5576_v4  ;;  %v1869_v17 = vand.u32 4294901760, %v5594_v53  ;;  %v5641_v44 = vsub.f32 %v509_v63, %v5596_v60 }
 0x154   :  { %1508 = vmatprep.subr.mxu0 %v6885_v19  ;;  %1598 = vmatprep.subr.mxu1 %v5232_v22  ;;  %v5605_v22 = vsub.f32 %v583_v61, %v5567_v11  ;;  %v5625_v23 = vand.u32 4294901760, %v409_v16  ;;  %v259_v61 = vsel %vm255_vm1, %v252_v56, %v254_v54  ;;  %v1853_v36 = vand.u32 4294901760, %v1852_v21 }
 0x155   :  { %1512 = vmatpush1.msra.mxu0 %v6886_v3  ;;  %1600 = vmatpush1.msra.mxu1 %v5236_v39  ;;  %v6784_v39 = vand.u32 4294901760, %v5584_v38  ;;  %v1881_v43 = vand.u32 4294901760, %v5613_v8  ;;  %v6783_v63 = vand.u32 4294901760, %v5641_v44  ;;  %v5677_v24 = vand.u32 4294901760, %v259_v61 }
 0x156   :  { %1547 = vmatmul.mubr.f32.vlgmr.msra.gmra.mxu0 %v5296_v50  ;;  %1602 = vmatprep.subr.mxu1 %v5315_v33  ;;  %v1858_v33 = vsub.f32 %v5559_v31, %v1857_v6  ;;  %v1875_v47 = vand.u32 4294901760, %v5605_v22  ;;  %v5699_v21 = vand.u32 4294901760, %v184_v37 }
 0x157   :  { %1686 = vmatprep.subr.mxu0 %v5508_v29  ;;  %1604 = vmatpush1.msra.mxu1 %v5317_v25  ;;  %v333_v25 = vsel %vm330_vm2, %v5340_v42, %v5526_v52  ;;  %v5655_v42 = vand.u32 4294901760, %v334_v12  ;;  %v5665_v52 = vsub.f32 %v409_v16, %v5625_v23  ;;  %v1894_v34 = vsub.f32 %v5641_v44, %v6783_v63 }
 0x158   :  { %1688 = vmatpush1.msra.mxu0 %v5524_v45  ;;  %1606 = vmatprep.subr.mxu1 %v5351_v0  ;;  %v258_v0 = vsel %vm255_vm1, %v5320_v32, %v252_v56  ;;  %v5667_v10 = vand.u32 4294901760, %v333_v25  ;;  %v6785_v32 = vand.u32 4294901760, %v5623_v57  ;;  %v6887_v56 = vld [vmem:[#allocation47_spill] sm:$0xff]  ;;  %v1859_v19 = vand.u32 4294901760, %v1858_v33 }
 0x159   :  { %1690 = vmatprep.subr.mxu0 %v5540_v55  ;;  %1608 = vmatpush1.msra.mxu1 %v5301_v1  ;;  %v1864_v1 = vsub.f32 %v5576_v4, %v1863_v51  ;;  %v183_v54 = vsel %vm180_vm0, %v6887_v56, %v177_v41  ;;  %v5686_v5 = vand.u32 4294901760, %v258_v0  ;;  %v1876_v16 = vsub.f32 %v5605_v22, %v1875_v47 }
 0x15a   :  { %1692 = vmatpush1.msra.mxu0 %v5561_v2  ;;  %1610 = vmatprep.subr.mxu1 %v5374_v46  ;;  %v1870_v46 = vsub.f32 %v5594_v53, %v1869_v17  ;;  %v5697_v3 = vsub.f32 %v334_v12, %v5655_v42  ;;  %v5706_v33 = vand.u32 4294901760, %v183_v54  ;;  %v1888_v12 = vsub.f32 %v5623_v57, %v6785_v32 }
 0x15b   :  { %1694 = vmatprep.subr.mxu0 %v5567_v11  ;;  %1612 = vmatpush1.msra.mxu1 %v5376_v15  ;;  %v5684_v15 = vsub.f32 %v408_v28, %v5648_v48  ;;  %v5704_v28 = vsub.f32 %v333_v25, %v5667_v10  ;;  %v1911_v41 = vand.u32 4294901760, %v5665_v52  ;;  %v5725_v30 = vsub.f32 %v258_v0, %v5686_v5 }
 0x15c   :  { %1696 = vmatpush1.msra.mxu0 %v5578_v9  ;;  %1614 = vmatprep.subr.mxu1 %v5405_v18  ;;  %v1882_v18 = vsub.f32 %v5613_v8, %v1881_v43  ;;  %v1871_v25 = vand.u32 4294901760, %v1870_v46  ;;  %v1877_v63 = vand.u32 4294901760, %v1876_v16  ;;  %v5736_v0 = vsub.f32 %v183_v54, %v5706_v33 }
 0x15d   :  { %1698 = vmatprep.subr.mxu0 %v5586_v20  ;;  %1616 = vmatpush1.msra.mxu1 %v5391_v62  ;;  %v1865_v62 = vand.u32 4294901760, %v1864_v1  ;;  %v5717_v1 = vsub.f32 %v259_v61, %v5677_v24  ;;  %v1917_v56 = vand.u32 4294901760, %v5684_v15  ;;  %v5729_v61 = vsub.f32 %v184_v37, %v5699_v21 }
 0x15e   :  { %1649 = vmatprep.mubr.f32.mxu1 %v6868_v14  ;;  %1700 = vmatpush1.msra.mxu0 %v5596_v60  ;;  %v1883_v46 = vand.u32 4294901760, %v1882_v18  ;;  %v6786_v32 = vand.u32 4294901760, %v5704_v28  ;;  %v1889_v16 = vand.u32 4294901760, %v1888_v12  ;;  %v1912_v37 = vsub.f32 %v5665_v52, %v1911_v41 }
 0x15f   :  { %1651 = vmatmul.mubr.f32.vlgmr.msra.gmra.mxu1 %v5296_v50  ;;  %1702 = vmatprep.subr.mxu0 %v5522_v26  ;;  %v1895_v18 = vand.u32 4294901760, %v1894_v34  ;;  %v1918_v54 = vsub.f32 %v5684_v15, %v1917_v56  ;;  %v1947_v12 = vand.u32 4294901760, %v5729_v61 }
 0x160   :  { %1854 = vmatprep.subr.mxu1 %v1853_v36  ;;  %1704 = vmatpush1.msra.mxu0 %v5547_v40  ;;  %v1906_v36 = vsub.f32 %v5584_v38, %v6784_v39  ;;  %v6787_v39 = vand.u32 4294901760, %v5697_v3  ;;  %v1930_v34 = vsub.f32 %v5704_v28, %v6786_v32 }
 0x161   :  { %1860 = vmatpush1.msra.mxu1 %v1859_v19  ;;  %1706 = vmatprep.subr.mxu0 %v5625_v23  ;;  %v1901_v19 = vand.u32 4294901760, %v5634_v59  ;;  %v1919_v32 = vand.u32 4294901760, %v1918_v54 }
 0x162   :  { %1866 = vmatprep.subr.mxu1 %v1865_v62  ;;  %1708 = vmatpush1.msra.mxu0 %v5648_v48  ;;  %v1907_v59 = vand.u32 4294901760, %v1906_v36  ;;  %v1935_v62 = vand.u32 4294901760, %v5717_v1  ;;  %v1953_v36 = vand.u32 4294901760, %v5736_v0 }
 0x163   :  { %1872 = vmatpush1.msra.mxu1 %v1871_v25  ;;  %1710 = vmatprep.subr.mxu0 %v5655_v42  ;;  %v6788_v25 = vand.u32 4294901760, %v5725_v30 }
 0x164   :  { %1878 = vmatprep.subr.mxu1 %v1877_v63  ;;  %1712 = vmatpush1.msra.mxu0 %v5667_v10  ;;  %v1924_v63 = vsub.f32 %v5697_v3, %v6787_v39  ;;  %v6888_v39 = vld [vmem:[#allocation48_spill] sm:$0xff] }
 0x165   :  { %1884 = vmatpush1.msra.mxu1 %v1883_v46  ;;  %1714 = vmatprep.subr.mxu0 %v5677_v24  ;;  %v1913_v46 = vand.u32 4294901760, %v1912_v37  ;;  %v1948_v37 = vsub.f32 %v5729_v61, %v1947_v12 }
 0x166   :  { %1890 = vmatprep.subr.mxu1 %v1889_v16  ;;  %1716 = vmatpush1.msra.mxu0 %v5686_v5  ;;  %v1936_v16 = vsub.f32 %v5717_v1, %v1935_v62 }
 0x167   :  { %1896 = vmatpush1.msra.mxu1 %v1895_v18  ;;  %1718 = vmatprep.subr.mxu0 %v5699_v21  ;;  %v1942_v18 = vsub.f32 %v5725_v30, %v6788_v25  ;;  %v1931_v25 = vand.u32 4294901760, %v1930_v34 }
 0x168   :  { %1902 = vmatprep.subr.mxu1 %v1901_v19  ;;  %1720 = vmatpush1.msra.mxu0 %v5706_v33  ;;  %v1925_v19 = vand.u32 4294901760, %v1924_v63  ;;  %v1937_v54 = vand.u32 4294901760, %v1936_v16  ;;  %v1949_v63 = vand.u32 4294901760, %v1948_v37 }
 0x169   :  { %1908 = vmatpush1.msra.mxu1 %v1907_v59  ;;  %1753 = vmatprep.mubr.f32.mxu0 %v6868_v14  ;;  %v1954_v59 = vsub.f32 %v5736_v0, %v1953_v36 }
 0x16a   :  { %1914 = vmatprep.subr.mxu1 %v1913_v46  ;;  %2041 = vmatprep.subr.mxu0 %v5532_v49  ;;  %v6890_v49 = vand.u32 4294901760, %v5623_v57 }
 0x16b   :  { %1759 = vmatmul.mubr.f32.vlgmr.msra.gmra.mxu0 %v6888_v39  ;;  %1920 = vmatpush1.msra.mxu1 %v1919_v32  ;;  %v1943_v39 = vand.u32 4294901760, %v1942_v18  ;;  %v1955_v46 = vand.u32 4294901760, %v1954_v59  ;;  %v6889_v32 = vld [vmem:[#allocation46_spill] sm:$0xff] }
 0x16c   :  { %2044 = vmatpush1.msra.mxu0 %v5559_v31  ;;  %1926 = vmatprep.subr.mxu1 %v1925_v19  ;;  %v6891_v31 = vand.u32 4294901760, %v5641_v44 }
 0x16d   :  { %2047 = vmatprep.subr.mxu0 %v5576_v4  ;;  %1932 = vmatpush1.msra.mxu1 %v1931_v25  ;;  %v6893_v4 = vand.u32 4294901760, %v5584_v38 }
 0x16e   :  { %2050 = vmatpush1.msra.mxu0 %v5594_v53  ;;  %1938 = vmatprep.subr.mxu1 %v1937_v54 }
 0x16f   :  { %2053 = vmatprep.subr.mxu0 %v5605_v22  ;;  %1944 = vmatpush1.msra.mxu1 %v1943_v39 }
 0x170   :  { %2056 = vmatpush1.msra.mxu0 %v5613_v8  ;;  %1950 = vmatprep.subr.mxu1 %v1949_v63 }
 0x171   :  { %2059 = vmatprep.subr.mxu0 %v5623_v57  ;;  %1956 = vmatpush1.msra.mxu1 %v1955_v46 }
 0x172   :  { %1989 = vmatprep.mubr.f32.mxu1 %v6868_v14  ;;  %2062 = vmatpush1.msra.mxu0 %v5641_v44 }
 0x173   :  { %1991 = vmatmul.mubr.f32.vlgmr.msra.gmra.mxu1 %v5296_v50  ;;  %2065 = vmatprep.subr.mxu0 %v5556_v7 }
 0x174   :  { %2163 = vmatprep.subr.mxu1 %v5508_v29  ;;  %2068 = vmatpush1.msra.mxu0 %v5584_v38 }
 0x175   :  { %2165 = vmatpush1.msra.mxu1 %v5524_v45  ;;  %2071 = vmatprep.subr.mxu0 %v5665_v52 }
 0x176   :  { %2167 = vmatprep.subr.mxu1 %v5540_v55  ;;  %2074 = vmatpush1.msra.mxu0 %v5684_v15 }
 0x177   :  { %2169 = vmatpush1.msra.mxu1 %v5561_v2  ;;  %2077 = vmatprep.subr.mxu0 %v5697_v3 }
 0x178   :  { %2171 = vmatprep.subr.mxu1 %v5567_v11  ;;  %2080 = vmatpush1.msra.mxu0 %v5704_v28 }
 0x179   :  { %2173 = vmatpush1.msra.mxu1 %v5578_v9  ;;  %2083 = vmatprep.subr.mxu0 %v5717_v1 }
 0x17a   :  { %2175 = vmatprep.subr.mxu1 %v5586_v20  ;;  %2086 = vmatpush1.msra.mxu0 %v5725_v30 }
 0x17b   :  { %2177 = vmatpush1.msra.mxu1 %v5596_v60  ;;  %2089 = vmatprep.subr.mxu0 %v5729_v61 }
 0x17c   :  { %2179 = vmatprep.subr.mxu1 %v5522_v26  ;;  %2092 = vmatpush1.msra.mxu0 %v5736_v0 }
 0x17d   :  { %2125 = vmatprep.mubr.f32.mxu0 %v6868_v14  ;;  %2181 = vmatpush1.msra.mxu1 %v5547_v40 }
 0x17e   :  { %2128 = vmatmul.mubr.f32.vlgmr.msra.gmra.mxu0 %v6889_v32  ;;  %2183 = vmatprep.subr.mxu1 %v5625_v23 }
 0x17f   :  { %2299 = vmatprep.subr.mxu0 %v1851_v27  ;;  %2185 = vmatpush1.msra.mxu1 %v5648_v48  ;;  %v6892_v27 = vand.u32 4294901760, %v5556_v7 }
 0x180   :  { %2303 = vmatpush1.msra.mxu0 %v1857_v6  ;;  %2187 = vmatprep.subr.mxu1 %v5655_v42 }
 0x181   :  { %2307 = vmatprep.subr.mxu0 %v1863_v51  ;;  %2189 = vmatpush1.msra.mxu1 %v5667_v10 }
 0x182   :  { %2311 = vmatpush1.msra.mxu0 %v1869_v17  ;;  %2191 = vmatprep.subr.mxu1 %v5677_v24 }
 0x183   :  { %2315 = vmatprep.subr.mxu0 %v1875_v47  ;;  %2193 = vmatpush1.msra.mxu1 %v5686_v5 }
 0x184   :  { %2319 = vmatpush1.msra.mxu0 %v1881_v43  ;;  %2195 = vmatprep.subr.mxu1 %v5699_v21 }
 0x185   :  { %2323 = vmatprep.subr.mxu0 %v6890_v49  ;;  %2197 = vmatpush1.msra.mxu1 %v5706_v33 }
 0x186   :  { %2230 = vmatprep.mubr.f32.mxu1 %v6868_v14  ;;  %2327 = vmatpush1.msra.mxu0 %v6891_v31  ;;  %v113_v31 = vld [vmem:[%s6718_s4] sm:$0xff] }
 0x187   :  { %2234 = vmatmul.mubr.f32.vlgmr.msra.gmra.mxu1 %v5357_v35  ;;  %2331 = vmatprep.subr.mxu0 %v6892_v27  ;;  %v6894_v35 = vand.u32 4294901760, %v5697_v3  ;;  %v112_v27 = vld [vmem:[%s6719_s3] sm:$0xff] }
 0x188   :  { %2437 = vmatprep.subr.mxu1 %v5508_v29  ;;  %2335 = vmatpush1.msra.mxu0 %v6893_v4  ;;  %v6895_v29 = vand.u32 4294901760, %v5704_v28  ;;  %v6897_v4 = vld [vmem:[#allocation11_spill] sm:$0xff] }
 0x189   :  { %2439 = vmatpush1.msra.mxu1 %v5524_v45  ;;  %2339 = vmatprep.subr.mxu0 %v1911_v41  ;;  %v6896_v45 = vand.u32 4294901760, %v5725_v30 }
 0x18a   :  { %2441 = vmatprep.subr.mxu1 %v5540_v55  ;;  %2343 = vmatpush1.msra.mxu0 %v1917_v56 }
 0x18b   :  { %2443 = vmatpush1.msra.mxu1 %v5561_v2  ;;  %2347 = vmatprep.subr.mxu0 %v6894_v35  ;;  %v6898_v35 = vld [vmem:[#allocation10_spill] sm:$0xff] }
 0x18c   :  { %2445 = vmatprep.subr.mxu1 %v5567_v11  ;;  %2351 = vmatpush1.msra.mxu0 %v6895_v29  ;;  %v6899_v29 = vld [vmem:[#allocation14_spill] sm:$0xff] }
 0x18d   :  { %2447 = vmatpush1.msra.mxu1 %v5578_v9  ;;  %2355 = vmatprep.subr.mxu0 %v1935_v62 }
 0x18e   :  { %2449 = vmatprep.subr.mxu1 %v5586_v20  ;;  %2359 = vmatpush1.msra.mxu0 %v6896_v45 }
 0x18f   :  { %2451 = vmatpush1.msra.mxu1 %v5596_v60  ;;  %2363 = vmatprep.subr.mxu0 %v1947_v12 }
 0x190   :  { %2453 = vmatprep.subr.mxu1 %v5522_v26  ;;  %2367 = vmatpush1.msra.mxu0 %v1953_v36  ;;  %v4746_v26 = vmov 0  }
 0x191   :  { %2400 = vmatprep.mubr.f32.mxu0 %v6868_v14  ;;  %2455 = vmatpush1.msra.mxu1 %v5547_v40 }
 0x192   :  { %2402 = vmatmul.mubr.f32.vlgmr.msra.gmra.mxu0 %v5296_v50  ;;  %2457 = vmatprep.subr.mxu1 %v5625_v23 }
 0x193   :  { %2504 = vmatprep.mubr.f32.mxu1 %v6868_v14  ;;  %2459 = vmatpush1.msra.mxu1 %v5648_v48 }
 0x194   :  { %3037 = vmatprep.mubr.f32.mxu0 %v6868_v14  ;;  %2461 = vmatprep.subr.mxu1 %v5655_v42 }
 0x195   :  { %2463 = vmatpush1.msra.mxu1 %v5667_v10  ;;  %4728 = vset.pattern.permute.xlu1 %v4746_v26 }
 0x196   :  { %2465 = vmatprep.subr.mxu1 %v5677_v24  ;;  %4727 = vset.pattern.permute.xlu0 %v4746_v26 }
 0x197   :  { %2467 = vmatpush1.msra.mxu1 %v5686_v5 }
 0x198   :  { %2469 = vmatprep.subr.mxu1 %v5699_v21 }
 0x199   :  { %2471 = vmatpush1.msra.mxu1 %v5706_v33 }
 0x19a   :  { %2506 = vmatmul.mubr.f32.vlgmr.msra.gmra.mxu1 %v5296_v50 }
 0x19b   :  { %3273 = vmatprep.mubr.f32.mxu1 %v6868_v14 }
 0x1f0   :  { %v905_v55 = vpop.f32.mrf.mxu0 }
 0x1f2   :  { %v907_v40 = vpop.f32.mrf.mxu0 }
 0x1f7   :  { %v1137_v7 = vpop.f32.mrf.mxu1 }
 0x1f8   :  { %v1138_v23 = vadd.f32 %v1137_v7, %v905_v55 }
 0x1f9   :  { %v1139_v11 = vpop.f32.mrf.mxu1 }
 0x1fa   :  { %v1140_v51 = vadd.f32 %v1139_v11, %v907_v40 }
 0x202   :  { %v1274_v2 = vpop.f32.mrf.mxu0 }
 0x203   :  { %v1275_v48 = vadd.f32 %v1274_v2, %v1138_v23 }
 0x204   :  { %v1276_v9 = vpop.f32.mrf.mxu0 }
 0x205   :  { %v1277_v17 = vadd.f32 %v1276_v9, %v1140_v51 }
 0x20b   :  { %v1380_v38 = vpop.f32.mrf.mxu1 }
 0x20c   :  { %v1381_v52 = vadd.f32 %v1380_v38, %v1275_v48 }
 0x20d   :  { %v1382_v30 = vpop.f32.mrf.mxu1 }
 0x20e   :  { %v1383_v47 = vadd.f32 %v1382_v30, %v1277_v17 }
 0x216   :  { %v1548_v20 = vpop.f32.mrf.mxu0 }
 0x217   :  { %v1549_v5 = vadd.f32 %v1548_v20, %v1381_v52 }
 0x218   :  { %v1550_v6 = vpop.f32.mrf.mxu0 }
 0x219   :  { %v1551_v10 = vadd.f32 %v1550_v6, %v1383_v47 }
 0x21f   :  { %v1652_v53 = vpop.f32.mrf.mxu1 }
 0x220   :  { %v1653_v41 = vadd.f32 %v1652_v53, %v1549_v5 }
 0x221   :  { %v1654_v22 = vpop.f32.mrf.mxu1 }
 0x222   :  { %v1655_v3 = vadd.f32 %v1654_v22, %v1551_v10  ;;  %v2518_v34 = vmul.f32 %v1653_v41, %v1653_v41  ;;  %v6901_v10 = vld [vmem:[#allocation13_spill] sm:$0xff] }
 0x224   :  { %v2519_v0 = vmul.f32 %v1655_v3, %v1655_v3  ;;  %v2512_v36 = vadd.f32 %v1655_v3, %v1653_v41 }
 0x226   :  { %v2522_v39 = vadd.f32 %v2519_v0, %v2518_v34  ;;  %v6906_v0 = vld [vmem:[#allocation12_spill] sm:$0xff] }
 0x22b   :  { %v1760_v60 = vpop.f32.mrf.mxu0 }
 0x22d   :  { %v1762_v8 = vpop.f32.mrf.mxu0 }
 0x233   :  { %v1992_v50 = vpop.f32.mrf.mxu1 }
 0x234   :  { %v1993_v24 = vadd.f32 %v1992_v50, %v1760_v60 }
 0x235   :  { %v1994_v44 = vpop.f32.mrf.mxu1 }
 0x236   :  { %v1995_v21 = vadd.f32 %v1994_v44, %v1762_v8 }
 0x23e   :  { %v2129_v57 = vpop.f32.mrf.mxu0 }
 0x23f   :  { %v2130_v28 = vadd.f32 %v2129_v57, %v1993_v24 }
 0x240   :  { %v2131_v43 = vpop.f32.mrf.mxu0 }
 0x241   :  { %v2132_v1 = vadd.f32 %v2131_v43, %v1995_v21 }
 0x247   :  { %v2235_v42 = vpop.f32.mrf.mxu1 }
 0x248   :  { %v2236_v56 = vadd.f32 %v2235_v42, %v2130_v28  ;;  %v6900_v42 = vld [vmem:[#allocation5_spill] sm:$0xff]  ;;  %v6904_v28 = vld [vmem:[#allocation4_spill] sm:$0xff] }
 0x249   :  { %v2237_v33 = vpop.f32.mrf.mxu1 }
 0x24a   :  { %v2238_v62 = vadd.f32 %v2237_v33, %v2132_v1 }
 0x252   :  { %v2403_v15 = vpop.f32.mrf.mxu0 }
 0x253   :  { %v2404_v25 = vadd.f32 %v2403_v15, %v2236_v56  ;;  %v6902_v15 = vld [vmem:[#allocation6_spill] sm:$0xff] }
 0x254   :  { %v2405_v61 = vpop.f32.mrf.mxu0 }
 0x255   :  { %v2406_v16 = vadd.f32 %v2405_v61, %v2238_v62 }
 0x25a   :  { %v2507_v12 = vpop.f32.mrf.mxu1 }
 0x25b   :  { %v2508_v18 = vadd.f32 %v2507_v12, %v2404_v25  ;;  %v6907_v25 = vld [vmem:[#allocation21_spill] sm:$0xff] }
 0x25c   :  { %v2509_v19 = vpop.f32.mrf.mxu1 }
 0x25d   :  { %v2520_v37 = vmul.f32 %v2508_v18, %v2508_v18  ;;  %v2510_v59 = vadd.f32 %v2509_v19, %v2406_v16  ;;  %v2513_v54 = vadd.f32 %v2512_v36, %v2508_v18  ;;  %v6908_v36 = vld [vmem:[#allocation15_spill] sm:$0xff] }
 0x25f   :  { %v2514_v63 = vadd.f32 %v2513_v54, %v2510_v59  ;;  %v2521_v46 = vmul.f32 %v2510_v59, %v2510_v59  ;;  %v2523_v32 = vadd.f32 %v2522_v39, %v2520_v37  ;;  %v6911_v39 = vld [vmem:[#allocation25_spill] sm:$0xff] }
 0x261   :  { %2515 = vadd.xlane.f32.xlu0 %v2514_v63  ;;  %v2524_v49 = vadd.f32 %v2523_v32, %v2521_v46  ;;  %v6912_v32 = vld [vmem:[#allocation17_spill] sm:$0xff] }
 0x263   :  { %2525 = vadd.xlane.f32.xlu1 %v2524_v49 }
 0x274   :  { %2551 = vperm.xlu1 %4728, %v113_v31   ;;  %v6913_v31 = vld [vmem:[#allocation26_spill] sm:$0xff] }
 0x277   :  { %2542 = vperm.xlu0 %4727, %v112_v27  }
 0x278   :  { %2658 = vrot.lane.b32.xlu1 %v6897_v4, %s4739_s19  ;;  %v6914_v4 = vld [vmem:[#allocation16_spill] sm:$0xff] }
 0x27b   :  { %2695 = vrot.lane.b32.xlu0 %v6898_v35, %s4740_s20 }
 0x27f   :  { %2621 = vrot.lane.b32.xlu0 %v6899_v29, %s4738_s18  ;;  %v6915_v29 = vld [vmem:[#allocation29_spill] sm:$0xff] }
 0x2ea   :  { %v2516_v45 = vpop.xlane.xlu0 %2515 }
 0x2eb   :  { %v2517_v26 = vmul.f32 0.001953125, %v2516_v45 }
 0x2ec   :  { %v2526_v55 = vpop.xlane.xlu1 %2525 }
 0x2ed   :  { %v2527_v40 = vmul.f32 0.001953125, %v2526_v55  ;;  %v2528_v7 = vmul.f32 %v2517_v26, %v2517_v26  ;;  %v2530_v9 = vsub.f32 %v1653_v41, %v2517_v26  ;;  %v2531_v38 = vsub.f32 %v1655_v3, %v2517_v26  ;;  %v6903_v3 = vld [vmem:[#allocation8_spill] sm:$0xff]  ;;  %v6905_v41 = vld [vmem:[#allocation19_spill] sm:$0xff] }
 0x2ee   :  { %v2532_v20 = vsub.f32 %v2508_v18, %v2517_v26  ;;  %v2533_v56 = vsub.f32 %v2510_v59, %v2517_v26  ;;  %v6909_v18 = vld [vmem:[#allocation23_spill] sm:$0xff]  ;;  %v6916_v26 = vld [vmem:[#allocation9_spill] sm:$0xff] }
 0x2ef   :  { %v2529_v2 = vsub.f32 %v2527_v40, %v2528_v7  ;;  %v6910_v59 = vld [vmem:[#allocation7_spill] sm:$0xff] }
 0x2f0   :  { %v2552_v57 = vpop.permute.xlu1 %2551  ;;  %v6917_v40 = vld [vmem:[#allocation31_spill] sm:$0xff] }
 0x2f1   :  { %v2534_v11 = vadd.f32 1e-05, %v2529_v2  ;;  %v6918_v2 = vld [vmem:[#allocation18_spill] sm:$0xff] }
 0x2f2   :  { %v2543_v22 = vpop.permute.xlu0 %2542 }
 0x2f3   :  { %4729 = vrsqrt.f32 %v2534_v11 }
 0x300   :  { %v4730_v30 = vpop.eup %4729 }
 0x301   :  { %v2536_v6 = vmul.f32 %v4730_v30, %v2530_v9  ;;  %v2537_v53 = vmul.f32 %v4730_v30, %v2531_v38  ;;  %v2538_v60 = vmul.f32 %v4730_v30, %v2532_v20  ;;  %v2539_v61 = vmul.f32 %v4730_v30, %v2533_v56  ;;  %v6919_v9 = vld [vmem:[#allocation34_spill] sm:$0xff]  ;;  %v6920_v20 = vld [vmem:[#allocation20_spill] sm:$0xff]  ;;  %v6935_v56 = vld [vmem:[#allocation39_spill] sm:$0xff] }
 0x303   :  { %v2545_v8 = vmul.f32 %v2543_v22, %v2536_v6  ;;  %v2546_v50 = vmul.f32 %v2543_v22, %v2537_v53  ;;  %v2547_v51 = vmul.f32 %v2543_v22, %v2538_v60  ;;  %v2548_v34 = vmul.f32 %v2543_v22, %v2539_v61  ;;  %v6921_v6 = vld [vmem:[#allocation36_spill] sm:$0xff]  ;;  %v6922_v60 = vld [vmem:[#allocation22_spill] sm:$0xff] }
 0x305   :  { %v2554_v23 = vadd.f32 %v2552_v57, %v2545_v8  ;;  %v2555_v17 = vadd.f32 %v2552_v57, %v2546_v50  ;;  %v2556_v44 = vadd.f32 %v2552_v57, %v2547_v51  ;;  %v2557_v37 = vadd.f32 %v2552_v57, %v2548_v34  ;;  %v6923_v8 = vld [vmem:[#allocation38_spill] sm:$0xff]  ;;  %v6924_v51 = vld [vmem:[#allocation40_spill] sm:$0xff] }
 0x307   :  { %v5888_v48 = vmax.f32 %v2555_v17, 0.0  ;;  %v5890_v47 = vmax.f32 %v2554_v23, 0.0  ;;  %v5892_v43 = vmax.f32 %v2556_v44, 0.0  ;;  %v5930_v46 = vmax.f32 %v2557_v37, 0.0  ;;  %v6925_v23 = vld [vmem:[#allocation24_spill] sm:$0xff]  ;;  %v6926_v44 = vld [vmem:[#allocation41_spill] sm:$0xff] }
 0x309   :  { %v2846_v52 = vmul.f32 %v5888_v48, %v6900_v42  ;;  %v2772_v24 = vmul.f32 %v5888_v48, %v6901_v10  ;;  %v2847_v5 = vmul.f32 %v5892_v43, %v6902_v15  ;;  %v2771_v21 = vmul.f32 %v5890_v47, %v6903_v3  ;;  %v6928_v10 = vld [vmem:[#allocation43_spill] sm:$0xff]  ;;  %v6929_v15 = vld [vmem:[#allocation28_spill] sm:$0xff] }
 0x30a   :  { %v2845_v33 = vmul.f32 %v5890_v47, %v6904_v28  ;;  %v2736_v1 = vmul.f32 %v5892_v43, %v6905_v41  ;;  %v2809_v62 = vmul.f32 %v5888_v48, %v6906_v0  ;;  %v2686_v12 = vmul.f32 %v5890_v47, %v6907_v25  ;;  %v6931_v3 = vld [vmem:[#allocation32_spill] sm:$0xff]  ;;  %v6933_v28 = vld [vmem:[#allocation33_spill] sm:$0xff]  ;;  %v6936_v0 = vld [vmem:[#allocation42_spill] sm:$0xff]  ;;  %v2696_v25 = vpop.permute.xlu0 %2695 }
 0x30b   :  { %2857 = vrot.lane.b32.xlu1 %v2846_v52, %s4744_s24  ;;  %2783 = vrot.lane.b32.xlu0 %v2772_v24, %s4742_s22  ;;  %v2810_v16 = vmul.f32 %v5892_v43, %v6908_v36  ;;  %v2650_v19 = vmul.f32 %v5888_v48, %v6909_v18  ;;  %v2808_v54 = vmul.f32 %v5890_v47, %v6910_v59  ;;  %v6927_v52 = vld [vmem:[#allocation27_spill] sm:$0xff]  ;;  %v6934_v41 = vld [vmem:[#allocation37_spill] sm:$0xff] }
 0x30c   :  { %v2612_v63 = vmul.f32 %v5890_v47, %v6911_v39  ;;  %v2773_v49 = vmul.f32 %v5892_v43, %v6912_v32  ;;  %v2576_v27 = vmul.f32 %v5888_v48, %v6913_v31  ;;  %v2735_v35 = vmul.f32 %v5888_v48, %v6914_v4 }
 0x30d   :  { %v2848_v45 = vmul.f32 %v5930_v46, %v6915_v29  ;;  %v2734_v55 = vmul.f32 %v5890_v47, %v6916_v26  ;;  %v2811_v7 = vmul.f32 %v5930_v46, %v6917_v40  ;;  %v2687_v11 = vmul.f32 %v5888_v48, %v6918_v2 }
 0x30e   :  { %v2774_v38 = vmul.f32 %v5930_v46, %v6919_v9  ;;  %v2649_v30 = vmul.f32 %v5890_v47, %v6920_v20  ;;  %v2737_v53 = vmul.f32 %v5930_v46, %v6921_v6  ;;  %v2613_v22 = vmul.f32 %v5888_v48, %v6922_v60  ;;  %v6004_v34 = vpop.permute.xlu0 %2621 }
 0x30f   :  { %2859 = vrot.lane.b32.xlu1 %v2847_v5, %s4744_s24  ;;  %2781 = vrot.lane.b32.xlu0 %v2771_v21, %s4742_s22  ;;  %v2688_v50 = vmul.f32 %v5892_v43, %v6923_v8  ;;  %v2651_v57 = vmul.f32 %v5892_v43, %v6924_v51  ;;  %v2575_v17 = vmul.f32 %v5890_v47, %v6925_v23  ;;  %v6930_v5 = vld [vmem:[#allocation30_spill] sm:$0xff]  ;;  %v6932_v21 = vld [vmem:[#allocation35_spill] sm:$0xff]  ;;  %v6937_v8 = vld [vmem:[#allocation44_spill] sm:$0xff] }
 0x310   :  { %v2614_v42 = vmul.f32 %v5892_v43, %v6926_v44  ;;  %v2577_v24 = vmul.f32 %v5892_v43, %v6928_v10  ;;  %v2615_v61 = vmul.f32 %v5930_v46, %v6935_v56  ;;  %v6938_v44 = vld [vmem:[#allocation45_spill] sm:$0xff] }
 0x313   :  { %2855 = vrot.lane.b32.xlu1 %v2845_v33, %s4744_s24  ;;  %2748 = vrot.lane.b32.xlu0 %v2736_v1, %s4741_s21  ;;  %v2689_v33 = vmul.f32 %v5930_v46, %v6933_v28  ;;  %v2652_v1 = vmul.f32 %v5930_v46, %v6934_v41 }
 0x317   :  { %2820 = vrot.lane.b32.xlu1 %v2809_v62, %s4743_s23  ;;  %2697 = vrot.lane.b32.xlu0 %v2686_v12, %s4740_s20  ;;  %v2578_v62 = vmul.f32 %v5930_v46, %v6936_v0  ;;  %v6002_v12 = vpop.permute.xlu1 %2658 }
 0x31b   :  { %2822 = vrot.lane.b32.xlu1 %v2810_v16, %s4743_s23  ;;  %2662 = vrot.lane.b32.xlu0 %v2650_v19, %s4739_s19 }
 0x31f   :  { %2818 = vrot.lane.b32.xlu1 %v2808_v54, %s4743_s23  ;;  %2623 = vrot.lane.b32.xlu0 %v2612_v63, %s4738_s18 }
 0x323   :  { %2785 = vrot.lane.b32.xlu1 %v2773_v49, %s4742_s22  ;;  %2588 = vrot.lane.b32.xlu0 %v2576_v27, %s4737_s9 }
 0x327   :  { %2746 = vrot.lane.b32.xlu1 %v2735_v35, %s4741_s21  ;;  %2861 = vrot.lane.b32.xlu0 %v2848_v45, %s4744_s24 }
 0x32b   :  { %2744 = vrot.lane.b32.xlu1 %v2734_v55, %s4741_s21  ;;  %2824 = vrot.lane.b32.xlu0 %v2811_v7, %s4743_s23 }
 0x32f   :  { %2699 = vrot.lane.b32.xlu1 %v2687_v11, %s4740_s20  ;;  %2787 = vrot.lane.b32.xlu0 %v2774_v38, %s4742_s22 }
 0x333   :  { %2660 = vrot.lane.b32.xlu1 %v2649_v30, %s4739_s19  ;;  %2750 = vrot.lane.b32.xlu0 %v2737_v53, %s4741_s21 }
 0x337   :  { %2625 = vrot.lane.b32.xlu1 %v2613_v22, %s4738_s18  ;;  %2701 = vrot.lane.b32.xlu0 %v2688_v50, %s4740_s20  ;;  %v2722_v50 = vmul.f32 %v5888_v48, %v6937_v8 }
 0x33b   :  { %2664 = vrot.lane.b32.xlu0 %v2651_v57, %s4739_s19  ;;  %2586 = vrot.lane.b32.xlu1 %v2575_v17, %s4737_s9 }
 0x33f   :  { %2627 = vrot.lane.b32.xlu0 %v2614_v42, %s4738_s18  ;;  %2584 = vrot.lane.b32.xlu1 %v6927_v52, %s4737_s9  ;;  %v2721_v42 = vmul.f32 %v5890_v47, %v6938_v44 }
 0x341   :  { %v6087_v41 = vand.u32 4294901760, %v2721_v42 }
 0x343   :  { %2590 = vrot.lane.b32.xlu0 %v2577_v24, %s4737_s9  ;;  %2863 = vrot.lane.b32.xlu1 %v6929_v15, %s4744_s24  ;;  %v6072_v15 = vand.u32 4294901760, %v2722_v50 }
 0x347   :  { %2826 = vrot.lane.b32.xlu1 %v6930_v5, %s4743_s23 }
 0x34b   :  { %2789 = vrot.lane.b32.xlu1 %v6931_v3, %s4742_s22 }
 0x34f   :  { %2752 = vrot.lane.b32.xlu1 %v6932_v21, %s4741_s21 }
 0x353   :  { %2703 = vrot.lane.b32.xlu1 %v2689_v33, %s4740_s20 }
 0x357   :  { %2666 = vrot.lane.b32.xlu1 %v2652_v1, %s4739_s19 }
 0x35b   :  { %2629 = vrot.lane.b32.xlu1 %v2615_v61, %s4738_s18 }
 0x35f   :  { %2592 = vrot.lane.b32.xlu1 %v2578_v62, %s4737_s9  ;;  %v6096_v62 = vsub.f32 %v2722_v50, %v6072_v15 }
 0x37d   :  { %v2858_v36 = vpop.permute.xlu1 %2857  ;;  %v2784_v16 = vpop.permute.xlu0 %2783 }
 0x381   :  { %v6006_v18 = vpop.permute.xlu1 %2859  ;;  %v2782_v63 = vpop.permute.xlu0 %2781 }
 0x382   :  { %v2866_v19 = vsel %vm151_vm7, %v2858_v36, %v6006_v18  ;;  %v2791_v45 = vsel %vm301_vm5, %v2782_v63, %v2784_v16 }
 0x383   :  { %v6010_v37 = vand.u32 4294901760, %v2866_v19  ;;  %v6040_v9 = vand.u32 4294901760, %v2791_v45 }
 0x385   :  { %v6013_v59 = vsub.f32 %v2866_v19, %v6010_v37  ;;  %2970 = vmatprep.subr.mxu0 %v6010_v37  ;;  %v2856_v54 = vpop.permute.xlu1 %2855  ;;  %v6032_v55 = vpop.permute.xlu0 %2748  ;;  %v6051_v22 = vsub.f32 %v2791_v45, %v6040_v9 }
 0x386   :  { %v2865_v39 = vsel %vm151_vm7, %v2856_v54, %v2858_v36 }
 0x387   :  { %v6017_v32 = vand.u32 4294901760, %v2865_v39  ;;  %v6803_v49 = vand.u32 4294901760, %v6013_v59  ;;  %v6795_v24 = vand.u32 4294901760, %v6051_v22 }
 0x389   :  { %v6021_v31 = vsub.f32 %v2865_v39, %v6017_v32  ;;  %2972 = vmatpush1.msra.mxu0 %v6017_v32  ;;  %v2821_v27 = vpop.permute.xlu1 %2820  ;;  %v3136_v4 = vsub.f32 %v6013_v59, %v6803_v49  ;;  %v2698_v6 = vpop.permute.xlu0 %2697  ;;  %v3166_v0 = vsub.f32 %v6051_v22, %v6795_v24  ;;  %v6109_v39 = vsub.f32 %v2721_v42, %v6087_v41 }
 0x38a   :  { %v2705_v28 = vsel %vm405_vm3, %v2696_v25, %v2698_v6 }
 0x38b   :  { %v6800_v35 = vand.u32 4294901760, %v6021_v31  ;;  %v3137_v29 = vand.u32 4294901760, %v3136_v4  ;;  %v6098_v25 = vand.u32 4294901760, %v2705_v28 }
 0x38d   :  { %v3142_v26 = vsub.f32 %v6021_v31, %v6800_v35  ;;  %3138 = vmatprep.subr.mxu1 %v3137_v29  ;;  %v6034_v40 = vpop.permute.xlu1 %2822  ;;  %v6074_v5 = vpop.permute.xlu0 %2662  ;;  %v3167_v29 = vand.u32 4294901760, %v3166_v0 }
 0x38e   :  { %v2829_v7 = vsel %vm226_vm6, %v2821_v27, %v6034_v40 }
 0x38f   :  { %v6038_v2 = vand.u32 4294901760, %v2829_v7  ;;  %v3143_v11 = vand.u32 4294901760, %v3142_v26  ;;  %v6790_v26 = vand.u32 4294901760, %v6096_v62 }
 0x391   :  { %v6043_v38 = vsub.f32 %v2829_v7, %v6038_v2  ;;  %2974 = vmatprep.subr.mxu0 %v6038_v2  ;;  %3144 = vmatpush1.msra.mxu1 %v3143_v11  ;;  %v2819_v20 = vpop.permute.xlu1 %2818  ;;  %v2624_v63 = vpop.permute.xlu0 %2623  ;;  %v2562_v7 = vld [vmem:[%s6720_s5] sm:$0xff]  ;;  %v6119_v11 = vsub.f32 %v2705_v28, %v6098_v25 }
 0x392   :  { %v2828_v30 = vsel %vm226_vm6, %v2819_v20, %v2821_v27  ;;  %v2631_v8 = vsel %vm255_vm1, %v6004_v34, %v2624_v63 }
 0x393   :  { %v6047_v53 = vand.u32 4294901760, %v2828_v30  ;;  %v6799_v60 = vand.u32 4294901760, %v6043_v38 }
 0x395   :  { %v6056_v51 = vsub.f32 %v2828_v30, %v6047_v53  ;;  %2976 = vmatpush1.msra.mxu0 %v6047_v53  ;;  %v6059_v57 = vpop.permute.xlu1 %2785  ;;  %v3148_v23 = vsub.f32 %v6043_v38, %v6799_v60 }
 0x396   :  { %v2792_v17 = vsel %vm301_vm5, %v2784_v16, %v6059_v57 }
 0x397   :  { %v6798_v52 = vand.u32 4294901760, %v6056_v51  ;;  %v6069_v48 = vand.u32 4294901760, %v2792_v17  ;;  %v3149_v10 = vand.u32 4294901760, %v3148_v23 }
 0x399   :  { %v3154_v3 = vsub.f32 %v6056_v51, %v6798_v52  ;;  %v6080_v21 = vsub.f32 %v2792_v17, %v6069_v48  ;;  %3150 = vmatprep.subr.mxu1 %v3149_v10  ;;  %v2747_v47 = vpop.permute.xlu1 %2746  ;;  %2978 = vmatprep.subr.mxu0 %v6069_v48  ;;  %v6789_v17 = vand.u32 4294901760, %v6109_v39  ;;  %v6140_v10 = vand.u32 4294901760, %v2562_v7 }
 0x39a   :  { %v2755_v33 = vsel %vm376_vm4, %v2747_v47, %v6032_v55  ;;  %2980 = vmatpush1.msra.mxu0 %v6040_v9 }
 0x39b   :  { %v6089_v1 = vand.u32 4294901760, %v2755_v33  ;;  %v3155_v56 = vand.u32 4294901760, %v3154_v3  ;;  %v6796_v61 = vand.u32 4294901760, %v6080_v21  ;;  %v6792_v3 = vand.u32 4294901760, %v6119_v11 }
 0x39d   :  { %v6101_v36 = vsub.f32 %v2755_v33, %v6089_v1  ;;  %3156 = vmatpush1.msra.mxu1 %v3155_v56  ;;  %v2745_v16 = vpop.permute.xlu1 %2744  ;;  %2982 = vmatprep.subr.mxu0 %v6089_v1  ;;  %v3160_v19 = vsub.f32 %v6080_v21, %v6796_v61 }
 0x39e   :  { %v2754_v54 = vsel %vm376_vm4, %v2745_v16, %v2747_v47  ;;  %v6146_v47 = vand.u32 4294901760, %v2631_v8 }
 0x39f   :  { %v6111_v27 = vand.u32 4294901760, %v2754_v54  ;;  %v3161_v4 = vand.u32 4294901760, %v3160_v19  ;;  %v6793_v45 = vand.u32 4294901760, %v6101_v36  ;;  %v3190_v19 = vsub.f32 %v6109_v39, %v6789_v17 }
 0x3a1   :  { %v6122_v20 = vsub.f32 %v2754_v54, %v6111_v27  ;;  %v6124_v30 = vpop.permute.xlu1 %2699  ;;  %2984 = vmatpush1.msra.mxu0 %v6111_v27  ;;  %3162 = vmatprep.subr.mxu1 %v3161_v4  ;;  %v3172_v23 = vsub.f32 %v6101_v36, %v6793_v45  ;;  %v6200_v45 = vpop.permute.xlu0 %2588 }
 0x3a2   :  { %v2706_v50 = vsel %vm405_vm3, %v2698_v6, %v6124_v30  ;;  %2986 = vmatprep.subr.mxu0 %v6072_v15  ;;  %3168 = vmatpush1.msra.mxu1 %v3167_v29  ;;  %v3184_v6 = vsub.f32 %v6096_v62, %v6790_v26  ;;  %v6168_v29 = vsub.f32 %v2562_v7, %v6140_v10 }
 0x3a3   :  { %v6791_v44 = vand.u32 4294901760, %v6122_v20  ;;  %v6137_v42 = vand.u32 4294901760, %v2706_v50  ;;  %2988 = vmatpush1.msra.mxu0 %v6087_v41  ;;  %v3173_v34 = vand.u32 4294901760, %v3172_v23  ;;  %6941 = vst [vmem:[#allocation46_spill] sm:$0xff] %v6200_v45 }
 0x3a4   :  { %6939 = vst [vmem:[#allocation47_spill] sm:$0xff] %v6168_v29  ;;  %v3185_v23 = vand.u32 4294901760, %v3184_v6  ;;  %v3191_v6 = vand.u32 4294901760, %v3190_v19 }
 0x3a5   :  { %v3178_v28 = vsub.f32 %v6122_v20, %v6791_v44  ;;  %v6152_v33 = vsub.f32 %v2706_v50, %v6137_v42  ;;  %v2661_v56 = vpop.permute.xlu1 %2660  ;;  %2990 = vmatprep.subr.mxu0 %v6137_v42  ;;  %3174 = vmatprep.subr.mxu1 %v3173_v34  ;;  %v3202_v34 = vsub.f32 %v6119_v11, %v6792_v3 }
 0x3a6   :  { %v2668_v0 = vsel %vm330_vm2, %v6002_v12, %v2661_v56  ;;  %v2669_v16 = vsel %vm330_vm2, %v2661_v56, %v6074_v5  ;;  %2992 = vmatpush1.msra.mxu0 %v6098_v25  ;;  %v6175_v56 = vsub.f32 %v2631_v8, %v6146_v47 }
 0x3a7   :  { %v6163_v54 = vand.u32 4294901760, %v2669_v16  ;;  %v6165_v4 = vand.u32 4294901760, %v2668_v0  ;;  %v3179_v50 = vand.u32 4294901760, %v3178_v28  ;;  %v6794_v12 = vand.u32 4294901760, %v6152_v33 }
 0x3a9   :  { %v6178_v17 = vsub.f32 %v2669_v16, %v6163_v54  ;;  %v6181_v26 = vsub.f32 %v2668_v0, %v6165_v4  ;;  %v6183_v44 = vpop.permute.xlu1 %2625  ;;  %2994 = vmatprep.subr.mxu0 %v6163_v54  ;;  %3180 = vmatpush1.msra.mxu1 %v3179_v50  ;;  %v3196_v8 = vsub.f32 %v6152_v33, %v6794_v12  ;;  %v6196_v0 = vand.u32 4294901760, %v6168_v29 }
 0x3aa   :  { %6940 = vst [vmem:[#allocation48_spill] sm:$0xff] %v6183_v44  ;;  %v2632_v7 = vsel %vm255_vm1, %v2624_v63, %v6183_v44  ;;  %2996 = vmatpush1.msra.mxu0 %v6165_v4  ;;  %3186 = vmatprep.subr.mxu1 %v3185_v23  ;;  %v6802_v50 = vand.u32 4294901760, %v6175_v56  ;;  %v3203_v23 = vand.u32 4294901760, %v3202_v34 }
 0x3ab   :  { %v6797_v28 = vand.u32 4294901760, %v6181_v26  ;;  %v6193_v16 = vand.u32 4294901760, %v2632_v7  ;;  %3192 = vmatpush1.msra.mxu1 %v3191_v6  ;;  %v3197_v3 = vand.u32 4294901760, %v3196_v8  ;;  %v6801_v63 = vand.u32 4294901760, %v6178_v17 }
 0x3ad   :  { %v3214_v19 = vsub.f32 %v6181_v26, %v6797_v28  ;;  %v6206_v12 = vsub.f32 %v2632_v7, %v6193_v16  ;;  %v2587_v24 = vpop.permute.xlu1 %2586  ;;  %2998 = vmatprep.subr.mxu0 %v6193_v16  ;;  %3198 = vmatprep.subr.mxu1 %v3197_v3  ;;  %v3208_v8 = vsub.f32 %v6178_v17, %v6801_v63 }
 0x3ae   :  { %v2595_v6 = vsel %vm180_vm0, %v2587_v24, %v6200_v45  ;;  %3000 = vmatpush1.msra.mxu0 %v6146_v47  ;;  %3204 = vmatpush1.msra.mxu1 %v3203_v23  ;;  %v3041_v7 = vsub.f32 %v6168_v29, %v6196_v0  ;;  %v3226_v3 = vsub.f32 %v6175_v56, %v6802_v50 }
 0x3af   :  { %v6215_v61 = vand.u32 4294901760, %v2595_v6  ;;  %v3215_v28 = vand.u32 4294901760, %v3214_v19  ;;  %v3209_v52 = vand.u32 4294901760, %v3208_v8  ;;  %v6808_v34 = vand.u32 4294901760, %v6206_v12 }
 0x3b0   :  { %v6233_v8 = vand.u32 4294901760, %v3041_v7 }
 0x3b1   :  { %v6224_v60 = vsub.f32 %v2595_v6, %v6215_v61  ;;  %v2585_v35 = vpop.permute.xlu1 %2584  ;;  %3002 = vmatprep.subr.mxu0 %v6215_v61  ;;  %3210 = vmatprep.subr.mxu1 %v3209_v52  ;;  %v3220_v19 = vsub.f32 %v6206_v12, %v6808_v34  ;;  %v6236_v6 = vpop.permute.xlu0 %2861 }
 0x3b2   :  { %v2594_v63 = vsel %vm180_vm0, %v2585_v35, %v2587_v24  ;;  %3216 = vmatpush1.msra.mxu1 %v3215_v28  ;;  %v3227_v35 = vand.u32 4294901760, %v3226_v3 }
 0x3b3   :  { %v6231_v23 = vand.u32 4294901760, %v2594_v63  ;;  %v6807_v50 = vand.u32 4294901760, %v6224_v60  ;;  %v3221_v49 = vand.u32 4294901760, %v3220_v19 }
 0x3b5   :  { %v6239_v45 = vsub.f32 %v2594_v63, %v6231_v23  ;;  %v6241_v44 = vpop.permute.xlu1 %2863  ;;  %3004 = vmatpush1.msra.mxu0 %v6231_v23  ;;  %v3232_v52 = vsub.f32 %v6224_v60, %v6807_v50  ;;  %3222 = vmatprep.subr.mxu1 %v3221_v49  ;;  %v6257_v49 = vpop.permute.xlu0 %2824 }
 0x3b6   :  { %3325 = vmatprep.subr.mxu0 %v6013_v59  ;;  %3228 = vmatpush1.msra.mxu1 %v3227_v35 }
 0x3b7   :  { %v6806_v24 = vand.u32 4294901760, %v6239_v45  ;;  %3043 = vmatmul.mubr.f32.vlgmr.msra.gmra.mxu0 %v6233_v8  ;;  %v3233_v28 = vand.u32 4294901760, %v3232_v52 }
 0x3b8   :  { %3328 = vmatpush1.msra.mxu0 %v6021_v31  ;;  %3409 = vmatprep.mubr.f32.mxu0 %v6868_v14 }
 0x3b9   :  { %v3238_v63 = vsub.f32 %v6239_v45, %v6806_v24  ;;  %3331 = vmatprep.subr.mxu0 %v6043_v38  ;;  %3234 = vmatprep.subr.mxu1 %v3233_v28  ;;  %v6259_v7 = vpop.permute.xlu1 %2826  ;;  %v6270_v19 = vpop.permute.xlu0 %2787  ;;  %v6944_v24 = vand.u32 4294901760, %v6043_v38  ;;  %v6947_v38 = vand.u32 4294901760, %v6051_v22 }
 0x3ba   :  { %3334 = vmatpush1.msra.mxu0 %v6056_v51 }
 0x3bb   :  { %3337 = vmatprep.subr.mxu0 %v6080_v21  ;;  %v3239_v3 = vand.u32 4294901760, %v3238_v63  ;;  %v6942_v63 = vand.u32 4294901760, %v6013_v59  ;;  %v6946_v59 = vand.u32 4294901760, %v6080_v21  ;;  %v2724_v21 = vmul.f32 %v5930_v46, %v5476_v13 }
 0x3bc   :  { %3340 = vmatpush1.msra.mxu0 %v6051_v22  ;;  %v6950_v22 = vand.u32 4294901760, %v6096_v62  ;;  %v6951_v13 = vand.u32 4294901760, %v6109_v39  ;;  %v2831_v46 = vsel %vm226_vm6, %v6257_v49, %v6259_v7 }
 0x3bd   :  { %3343 = vmatprep.subr.mxu0 %v6101_v36  ;;  %3240 = vmatpush1.msra.mxu1 %v3239_v3  ;;  %v2790_v35 = vpop.permute.xlu1 %2789  ;;  %v2751_v52 = vpop.permute.xlu0 %2750  ;;  %v6943_v3 = vand.u32 4294901760, %v6021_v31  ;;  %v2867_v31 = vsel %vm151_vm7, %v6006_v18, %v6236_v6  ;;  %v2868_v18 = vsel %vm151_vm7, %v6236_v6, %v6241_v44  ;;  %v6952_v44 = vand.u32 4294901760, %v6152_v33 }
 0x3be   :  { %3346 = vmatpush1.msra.mxu0 %v6122_v20  ;;  %3275 = vmatmul.mubr.f32.vlgmr.msra.gmra.mxu1 %v6140_v10  ;;  %v6955_v6 = vand.u32 4294901760, %v6181_v26  ;;  %v2756_v7 = vsel %vm376_vm4, %v6032_v55, %v2751_v52  ;;  %v6958_v55 = vand.u32 4294901760, %v6224_v60 }
 0x3bf   :  { %3349 = vmatprep.subr.mxu0 %v6096_v62  ;;  %3447 = vmatprep.subr.mxu1 %v6010_v37  ;;  %v6350_v62 = vand.u32 4294901760, %v2724_v21 }
 0x3c0   :  { %3352 = vmatpush1.msra.mxu0 %v6109_v39  ;;  %3449 = vmatpush1.msra.mxu1 %v6017_v32 }
 0x3c1   :  { %3355 = vmatprep.subr.mxu0 %v6152_v33  ;;  %3451 = vmatprep.subr.mxu1 %v6038_v2  ;;  %v2753_v28 = vpop.permute.xlu1 %2752  ;;  %v6299_v50 = vpop.permute.xlu0 %2701  ;;  %v6954_v33 = vand.u32 4294901760, %v6178_v17 }
 0x3c2   :  { %3358 = vmatpush1.msra.mxu0 %v6119_v11  ;;  %3453 = vmatpush1.msra.mxu1 %v6047_v53 }
 0x3c3   :  { %3361 = vmatprep.subr.mxu0 %v6178_v17  ;;  %3455 = vmatprep.subr.mxu1 %v6069_v48  ;;  %v6956_v17 = vand.u32 4294901760, %v6206_v12 }
 0x3c4   :  { %3364 = vmatpush1.msra.mxu0 %v6181_v26  ;;  %3457 = vmatpush1.msra.mxu1 %v6040_v9 }
 0x3c5   :  { %3367 = vmatprep.subr.mxu0 %v6206_v12  ;;  %3459 = vmatprep.subr.mxu1 %v6089_v1  ;;  %v6301_v34 = vpop.permute.xlu1 %2703 }
 0x3c6   :  { %3370 = vmatpush1.msra.mxu0 %v6175_v56  ;;  %3461 = vmatpush1.msra.mxu1 %v6111_v27 }
 0x3c7   :  { %3373 = vmatprep.subr.mxu0 %v6224_v60  ;;  %3463 = vmatprep.subr.mxu1 %v6072_v15  ;;  %v2708_v60 = vsel %vm405_vm3, %v6299_v50, %v6301_v34 }
 0x3c8   :  { %3376 = vmatpush1.msra.mxu0 %v6239_v45  ;;  %3465 = vmatpush1.msra.mxu1 %v6087_v41 }
 0x3c9   :  { %3412 = vmatmul.mubr.f32.vlgmr.msra.gmra.mxu0 %v6168_v29  ;;  %3467 = vmatprep.subr.mxu1 %v6137_v42  ;;  %v6945_v29 = vand.u32 4294901760, %v6056_v51  ;;  %v6949_v51 = vand.u32 4294901760, %v6122_v20  ;;  %v2667_v20 = vpop.permute.xlu1 %2666 }
 0x3ca   :  { %3583 = vmatprep.subr.mxu0 %v6942_v63  ;;  %3469 = vmatpush1.msra.mxu1 %v6098_v25  ;;  %v2665_v63 = vpop.permute.xlu0 %2664 }
 0x3cb   :  { %3587 = vmatpush1.msra.mxu0 %v6943_v3  ;;  %3471 = vmatprep.subr.mxu1 %v6163_v54  ;;  %v6959_v3 = vand.u32 4294901760, %v6239_v45 }
 0x3cc   :  { %3591 = vmatprep.subr.mxu0 %v6944_v24  ;;  %3473 = vmatpush1.msra.mxu1 %v6165_v4  ;;  %v6948_v24 = vand.u32 4294901760, %v6101_v36  ;;  %v2723_v36 = vmul.f32 %v5892_v43, %v5495_v58  ;;  %v2830_v58 = vsel %vm226_vm6, %v6034_v40, %v6257_v49  ;;  %v6345_v43 = vand.u32 4294901760, %v2868_v18 }
 0x3cd   :  { %3595 = vmatpush1.msra.mxu0 %v6945_v29  ;;  %3475 = vmatprep.subr.mxu1 %v6193_v16  ;;  %v6323_v29 = vand.u32 4294901760, %v2867_v31  ;;  %v6370_v49 = vand.u32 4294901760, %v2830_v58  ;;  %v2630_v26 = vpop.permute.xlu1 %2629 }
 0x3ce   :  { %3599 = vmatprep.subr.mxu0 %v6946_v59  ;;  %3477 = vmatpush1.msra.mxu1 %v6146_v47  ;;  %v6360_v40 = vand.u32 4294901760, %v2723_v36 }
 0x3cf   :  { %3603 = vmatpush1.msra.mxu0 %v6947_v38  ;;  %3479 = vmatprep.subr.mxu1 %v6215_v61  ;;  %v6353_v39 = vsub.f32 %v2867_v31, %v6323_v29  ;;  %v6407_v59 = vsub.f32 %v2830_v58, %v6370_v49 }
 0x3d0   :  { %3607 = vmatprep.subr.mxu0 %v6948_v24  ;;  %3481 = vmatpush1.msra.mxu1 %v6231_v23 }
 0x3d1   :  { %3514 = vmatprep.mubr.f32.mxu1 %v6868_v14  ;;  %3611 = vmatpush1.msra.mxu0 %v6949_v51  ;;  %v3996_v12 = vand.u32 4294901760, %v6353_v39 }
 0x3d2   :  { %3518 = vmatmul.mubr.f32.vlgmr.msra.gmra.mxu1 %v6196_v0  ;;  %3615 = vmatprep.subr.mxu0 %v6950_v22 }
 0x3d3   :  { %3721 = vmatprep.subr.mxu1 %v6010_v37  ;;  %3619 = vmatpush1.msra.mxu0 %v6951_v13  ;;  %v6953_v37 = vand.u32 4294901760, %v6119_v11  ;;  %v6365_v11 = vand.u32 4294901760, %v2831_v46  ;;  %v6429_v34 = vsub.f32 %v6353_v39, %v3996_v12 }
 0x3d4   :  { %3723 = vmatpush1.msra.mxu1 %v6017_v32  ;;  %3623 = vmatprep.subr.mxu0 %v6952_v44  ;;  %v2794_v32 = vsel %vm301_vm5, %v6270_v19, %v2790_v35  ;;  %v6957_v35 = vand.u32 4294901760, %v6175_v56 }
 0x3d5   :  { %3725 = vmatprep.subr.mxu1 %v6038_v2  ;;  %3627 = vmatpush1.msra.mxu0 %v6953_v37  ;;  %v2793_v2 = vsel %vm301_vm5, %v6059_v57, %v6270_v19  ;;  %v2628_v57 = vpop.permute.xlu0 %2627  ;;  %v6379_v19 = vsub.f32 %v2868_v18, %v6345_v43  ;;  %v2593_v18 = vpop.permute.xlu1 %2592 }
 0x3d6   :  { %3727 = vmatpush1.msra.mxu1 %v6047_v53  ;;  %3631 = vmatprep.subr.mxu0 %v6954_v33  ;;  %v2757_v53 = vsel %vm376_vm4, %v2751_v52, %v2753_v28  ;;  %v6390_v28 = vand.u32 4294901760, %v2793_v2  ;;  %v6396_v52 = vsub.f32 %v2723_v36, %v6360_v40 }
 0x3d7   :  { %3729 = vmatprep.subr.mxu1 %v6069_v48  ;;  %3635 = vmatpush1.msra.mxu0 %v6955_v6  ;;  %v6381_v48 = vand.u32 4294901760, %v2794_v32  ;;  %v6401_v56 = vand.u32 4294901760, %v2757_v53  ;;  %v3990_v31 = vand.u32 4294901760, %v6379_v19 }
 0x3d8   :  { %3731 = vmatpush1.msra.mxu1 %v6040_v9  ;;  %3639 = vmatprep.subr.mxu0 %v6956_v17  ;;  %v6387_v9 = vsub.f32 %v2724_v21, %v6350_v62  ;;  %v6443_v21 = vand.u32 4294901760, %v2708_v60 }
 0x3d9   :  { %3733 = vmatprep.subr.mxu1 %v6089_v1  ;;  %3643 = vmatpush1.msra.mxu0 %v6957_v35  ;;  %v6399_v1 = vsub.f32 %v2831_v46, %v6365_v11  ;;  %v6420_v45 = vsub.f32 %v2794_v32, %v6381_v48  ;;  %v2591_v24 = vpop.permute.xlu0 %2590  ;;  %v6441_v51 = vsub.f32 %v2757_v53, %v6401_v56 }
 0x3da   :  { %3735 = vmatpush1.msra.mxu1 %v6111_v27  ;;  %3647 = vmatprep.subr.mxu0 %v6958_v55  ;;  %v6409_v27 = vand.u32 4294901760, %v2756_v7  ;;  %v6811_v38 = vand.u32 4294901760, %v6387_v9  ;;  %v2597_v33 = vsel %vm180_vm0, %v2591_v24, %v2593_v18 }
 0x3db   :  { %3737 = vmatprep.subr.mxu1 %v6072_v15  ;;  %3651 = vmatpush1.msra.mxu0 %v6959_v3  ;;  %v2707_v15 = vsel %vm405_vm3, %v6124_v30, %v6299_v50  ;;  %v2671_v30 = vsel %vm330_vm2, %v2665_v63, %v2667_v20  ;;  %v2670_v50 = vsel %vm330_vm2, %v6074_v5, %v2665_v63  ;;  %v4002_v22 = vand.u32 4294901760, %v6399_v1  ;;  %v6960_v63 = vld [vmem:[#allocation48_spill] sm:$0xff] }
 0x3dc   :  { %3684 = vmatprep.mubr.f32.mxu0 %v6868_v14  ;;  %3739 = vmatpush1.msra.mxu1 %v6087_v41  ;;  %v6432_v41 = vsub.f32 %v2793_v2, %v6390_v28  ;;  %v6450_v36 = vsub.f32 %v2756_v7, %v6409_v27  ;;  %v6452_v20 = vand.u32 4294901760, %v2707_v15  ;;  %v2634_v5 = vsel %vm255_vm1, %v2628_v57, %v2630_v26 }
 0x3dd   :  { %3686 = vmatmul.mubr.f32.vlgmr.msra.gmra.mxu0 %v6140_v10  ;;  %3741 = vmatprep.subr.mxu1 %v6137_v42  ;;  %v6814_v42 = vand.u32 4294901760, %v6396_v52  ;;  %v2633_v13 = vsel %vm255_vm1, %v6960_v63, %v2628_v57  ;;  %v6459_v46 = vand.u32 4294901760, %v2671_v30  ;;  %v4014_v44 = vand.u32 4294901760, %v6420_v45 }
 0x3de   :  { %3825 = vmatprep.subr.mxu0 %v6345_v43  ;;  %3743 = vmatpush1.msra.mxu1 %v6098_v25  ;;  %v4008_v25 = vand.u32 4294901760, %v6407_v59  ;;  %v4020_v58 = vand.u32 4294901760, %v6432_v41  ;;  %v6468_v37 = vand.u32 4294901760, %v2670_v50  ;;  %v6478_v2 = vand.u32 4294901760, %v2634_v5 }
 0x3df   :  { %3827 = vmatpush1.msra.mxu0 %v6323_v29  ;;  %3745 = vmatprep.subr.mxu1 %v6163_v54  ;;  %v3991_v54 = vsub.f32 %v6379_v19, %v3990_v31  ;;  %v4003_v6 = vsub.f32 %v6399_v1, %v4002_v22  ;;  %v4026_v53 = vand.u32 4294901760, %v6441_v51  ;;  %v6491_v7 = vsub.f32 %v2707_v15, %v6452_v20 }
 0x3e0   :  { %3829 = vmatprep.subr.mxu0 %v6365_v11  ;;  %3747 = vmatpush1.msra.mxu1 %v6165_v4  ;;  %v6961_v4 = vld [vmem:[#allocation46_spill] sm:$0xff]  ;;  %v4009_v17 = vsub.f32 %v6407_v59, %v4008_v25  ;;  %v6493_v57 = vand.u32 4294901760, %v2633_v13  ;;  %v6500_v26 = vand.u32 4294901760, %v2597_v33  ;;  %v4015_v55 = vsub.f32 %v6420_v45, %v4014_v44 }
 0x3e1   :  { %3831 = vmatpush1.msra.mxu0 %v6370_v49  ;;  %3749 = vmatprep.subr.mxu1 %v6193_v16  ;;  %v2596_v32 = vsel %vm180_vm0, %v6961_v4, %v2591_v24  ;;  %v6476_v16 = vsub.f32 %v2708_v60, %v6443_v21  ;;  %v3992_v35 = vand.u32 4294901760, %v3991_v54  ;;  %v4021_v3 = vsub.f32 %v6432_v41, %v4020_v58 }
 0x3e2   :  { %3833 = vmatprep.subr.mxu0 %v6381_v48  ;;  %3751 = vmatpush1.msra.mxu1 %v6146_v47  ;;  %v6810_v47 = vand.u32 4294901760, %v6450_v36  ;;  %v6513_v60 = vand.u32 4294901760, %v2596_v32  ;;  %v3998_v15 = vand.u32 4294901760, %v6429_v34  ;;  %v4004_v24 = vand.u32 4294901760, %v4003_v6 }
 0x3e3   :  { %3835 = vmatpush1.msra.mxu0 %v6390_v28  ;;  %3753 = vmatprep.subr.mxu1 %v6215_v61  ;;  %v6498_v61 = vsub.f32 %v2671_v30, %v6459_v46  ;;  %v6519_v30 = vsub.f32 %v2634_v5, %v6478_v2  ;;  %v6812_v18 = vand.u32 4294901760, %v6476_v16  ;;  %v6813_v54 = vand.u32 4294901760, %v6491_v7 }
 0x3e4   :  { %3837 = vmatprep.subr.mxu0 %v6401_v56  ;;  %3755 = vmatpush1.msra.mxu1 %v6231_v23  ;;  %v6511_v23 = vsub.f32 %v2670_v50, %v6468_v37  ;;  %v4027_v50 = vsub.f32 %v6441_v51, %v4026_v53  ;;  %v4033_v63 = vsub.f32 %v6450_v36, %v6810_v47  ;;  %v4010_v5 = vand.u32 4294901760, %v4009_v17 }
 0x3e5   :  { %3788 = vmatprep.mubr.f32.mxu1 %v6868_v14  ;;  %3839 = vmatpush1.msra.mxu0 %v6409_v27  ;;  %v6531_v34 = vsub.f32 %v2633_v13, %v6493_v57  ;;  %v6535_v4 = vsub.f32 %v2597_v33, %v6500_v26  ;;  %v4016_v6 = vand.u32 4294901760, %v4015_v55  ;;  %v4062_v47 = vand.u32 4294901760, %v6498_v61 }
 0x3e6   :  { %3790 = vmatmul.mubr.f32.vlgmr.msra.gmra.mxu1 %v6140_v10  ;;  %3841 = vmatprep.subr.mxu0 %v6350_v62  ;;  %v6815_v13 = vand.u32 4294901760, %v6511_v23  ;;  %v4022_v33 = vand.u32 4294901760, %v4021_v3  ;;  %v4045_v17 = vsub.f32 %v6396_v52, %v6814_v42  ;;  %v4028_v55 = vand.u32 4294901760, %v4027_v50 }
 0x3e7   :  { %3993 = vmatprep.subr.mxu1 %v3992_v35  ;;  %3843 = vmatpush1.msra.mxu0 %v6360_v40  ;;  %v4039_v35 = vsub.f32 %v6387_v9, %v6811_v38  ;;  %v4074_v38 = vand.u32 4294901760, %v6519_v30  ;;  %v4080_v3 = vand.u32 4294901760, %v6531_v34 }
 0x3e8   :  { %3999 = vmatpush1.msra.mxu1 %v3998_v15  ;;  %3845 = vmatprep.subr.mxu0 %v6443_v21  ;;  %v6544_v15 = vsub.f32 %v2596_v32, %v6513_v60  ;;  %v4057_v32 = vsub.f32 %v6491_v7, %v6813_v54  ;;  %v4069_v54 = vsub.f32 %v6511_v23, %v6815_v13 }
 0x3e9   :  { %4005 = vmatprep.subr.mxu1 %v4004_v24  ;;  %3847 = vmatpush1.msra.mxu0 %v6452_v20  ;;  %v4051_v24 = vsub.f32 %v6476_v16, %v6812_v18  ;;  %v4040_v50 = vand.u32 4294901760, %v4039_v35  ;;  %v4086_v18 = vand.u32 4294901760, %v6535_v4 }
 0x3ea   :  { %4011 = vmatpush1.msra.mxu1 %v4010_v5  ;;  %3849 = vmatprep.subr.mxu0 %v6459_v46  ;;  %v4034_v5 = vand.u32 4294901760, %v4033_v63  ;;  %v4092_v42 = vand.u32 4294901760, %v6544_v15  ;;  %v4046_v63 = vand.u32 4294901760, %v4045_v17  ;;  %v4058_v13 = vand.u32 4294901760, %v4057_v32 }
 0x3eb   :  { %4017 = vmatprep.subr.mxu1 %v4016_v6  ;;  %3851 = vmatpush1.msra.mxu0 %v6468_v37  ;;  %v4063_v6 = vsub.f32 %v6498_v61, %v4062_v47  ;;  %v4052_v35 = vand.u32 4294901760, %v4051_v24  ;;  %v4087_v24 = vsub.f32 %v6535_v4, %v4086_v18 }
 0x3ec   :  { %4023 = vmatpush1.msra.mxu1 %v4022_v33  ;;  %3853 = vmatprep.subr.mxu0 %v6478_v2  ;;  %v4075_v33 = vsub.f32 %v6519_v30, %v4074_v38 }
 0x3ed   :  { %4029 = vmatprep.subr.mxu1 %v4028_v55  ;;  %3855 = vmatpush1.msra.mxu0 %v6493_v57  ;;  %v4081_v55 = vsub.f32 %v6531_v34, %v4080_v3  ;;  %v4064_v17 = vand.u32 4294901760, %v4063_v6 }
 0x3ee   :  { %4035 = vmatpush1.msra.mxu1 %v4034_v5  ;;  %3857 = vmatprep.subr.mxu0 %v6500_v26  ;;  %v4093_v5 = vsub.f32 %v6544_v15, %v4092_v42  ;;  %v4076_v32 = vand.u32 4294901760, %v4075_v33 }
 0x3ef   :  { %4041 = vmatprep.subr.mxu1 %v4040_v50  ;;  %3859 = vmatpush1.msra.mxu0 %v6513_v60  ;;  %v4070_v50 = vand.u32 4294901760, %v4069_v54  ;;  %v4082_v6 = vand.u32 4294901760, %v4081_v55 }
 0x3f0   :  { %4047 = vmatpush1.msra.mxu1 %v4046_v63  ;;  %3892 = vmatprep.mubr.f32.mxu0 %v6868_v14  ;;  %v4088_v63 = vand.u32 4294901760, %v4087_v24 }
 0x3f1   :  { %4053 = vmatprep.subr.mxu1 %v4052_v35  ;;  %4180 = vmatprep.subr.mxu0 %v6379_v19  ;;  %v4094_v35 = vand.u32 4294901760, %v4093_v5  ;;  %v6964_v19 = vand.u32 4294901760, %v6387_v9 }
 0x3f2   :  { %3898 = vmatmul.mubr.f32.vlgmr.msra.gmra.mxu0 %v6233_v8  ;;  %4059 = vmatpush1.msra.mxu1 %v4058_v13  ;;  %v6962_v8 = vld [vmem:[#allocation47_spill] sm:$0xff] }
 0x3f3   :  { %4183 = vmatpush1.msra.mxu0 %v6353_v39  ;;  %4065 = vmatprep.subr.mxu1 %v4064_v17  ;;  %v6963_v39 = vand.u32 4294901760, %v6450_v36 }
 0x3f4   :  { %4186 = vmatprep.subr.mxu0 %v6399_v1  ;;  %4071 = vmatpush1.msra.mxu1 %v4070_v50  ;;  %v6966_v1 = vand.u32 4294901760, %v6476_v16 }
 0x3f5   :  { %4189 = vmatpush1.msra.mxu0 %v6407_v59  ;;  %4077 = vmatprep.subr.mxu1 %v4076_v32  ;;  %v6967_v59 = vand.u32 4294901760, %v6491_v7 }
 0x3f6   :  { %4192 = vmatprep.subr.mxu0 %v6420_v45  ;;  %4083 = vmatpush1.msra.mxu1 %v4082_v6  ;;  %v2564_v6 = vld [vmem:[%s6721_s7] sm:$0xff] }
 0x3f7   :  { %4195 = vmatpush1.msra.mxu0 %v6432_v41  ;;  %4089 = vmatprep.subr.mxu1 %v4088_v63  ;;  %v2563_v63 = vld [vmem:[%s6722_s6] sm:$0xff] }
 0x3f8   :  { %4198 = vmatprep.subr.mxu0 %v6441_v51  ;;  %4095 = vmatpush1.msra.mxu1 %v4094_v35 }
 0x3f9   :  { %4128 = vmatprep.mubr.f32.mxu1 %v6868_v14  ;;  %4201 = vmatpush1.msra.mxu0 %v6450_v36 }
 0x3fa   :  { %4130 = vmatmul.mubr.f32.vlgmr.msra.gmra.mxu1 %v6140_v10  ;;  %4204 = vmatprep.subr.mxu0 %v6387_v9 }
 0x3fb   :  { %4302 = vmatprep.subr.mxu1 %v6345_v43  ;;  %4207 = vmatpush1.msra.mxu0 %v6396_v52 }
 0x3fc   :  { %4304 = vmatpush1.msra.mxu1 %v6323_v29  ;;  %4210 = vmatprep.subr.mxu0 %v6476_v16 }
 0x3fd   :  { %4306 = vmatprep.subr.mxu1 %v6365_v11  ;;  %4213 = vmatpush1.msra.mxu0 %v6491_v7 }
 0x3fe   :  { %4308 = vmatpush1.msra.mxu1 %v6370_v49  ;;  %4216 = vmatprep.subr.mxu0 %v6498_v61 }
 0x3ff   :  { %4310 = vmatprep.subr.mxu1 %v6381_v48  ;;  %4219 = vmatpush1.msra.mxu0 %v6511_v23 }
 0x400   :  { %4312 = vmatpush1.msra.mxu1 %v6390_v28  ;;  %4222 = vmatprep.subr.mxu0 %v6519_v30 }
 0x401   :  { %4314 = vmatprep.subr.mxu1 %v6401_v56  ;;  %4225 = vmatpush1.msra.mxu0 %v6531_v34 }
 0x402   :  { %4316 = vmatpush1.msra.mxu1 %v6409_v27  ;;  %4228 = vmatprep.subr.mxu0 %v6535_v4 }
 0x403   :  { %4318 = vmatprep.subr.mxu1 %v6350_v62  ;;  %4231 = vmatpush1.msra.mxu0 %v6544_v15 }
 0x404   :  { %4264 = vmatprep.mubr.f32.mxu0 %v6868_v14  ;;  %4320 = vmatpush1.msra.mxu1 %v6360_v40 }
 0x405   :  { %4267 = vmatmul.mubr.f32.vlgmr.msra.gmra.mxu0 %v6962_v8  ;;  %4322 = vmatprep.subr.mxu1 %v6443_v21 }
 0x406   :  { %4438 = vmatprep.subr.mxu0 %v3990_v31  ;;  %4324 = vmatpush1.msra.mxu1 %v6452_v20 }
 0x407   :  { %4442 = vmatpush1.msra.mxu0 %v3996_v12  ;;  %4326 = vmatprep.subr.mxu1 %v6459_v46  ;;  %v6965_v12 = vand.u32 4294901760, %v6396_v52 }
 0x408   :  { %4446 = vmatprep.subr.mxu0 %v4002_v22  ;;  %4328 = vmatpush1.msra.mxu1 %v6468_v37 }
 0x409   :  { %4450 = vmatpush1.msra.mxu0 %v4008_v25  ;;  %4330 = vmatprep.subr.mxu1 %v6478_v2 }
 0x40a   :  { %4454 = vmatprep.subr.mxu0 %v4014_v44  ;;  %4332 = vmatpush1.msra.mxu1 %v6493_v57 }
 0x40b   :  { %4458 = vmatpush1.msra.mxu0 %v4020_v58  ;;  %4334 = vmatprep.subr.mxu1 %v6500_v26 }
 0x40c   :  { %4462 = vmatprep.subr.mxu0 %v4026_v53  ;;  %4336 = vmatpush1.msra.mxu1 %v6513_v60 }
 0x40d   :  { %4369 = vmatprep.mubr.f32.mxu1 %v6868_v14  ;;  %4466 = vmatpush1.msra.mxu0 %v6963_v39 }
 0x40e   :  { %4373 = vmatmul.mubr.f32.vlgmr.msra.gmra.mxu1 %v6196_v0  ;;  %4470 = vmatprep.subr.mxu0 %v6964_v19  ;;  %v6968_v0 = vand.u32 4294901760, %v6511_v23 }
 0x40f   :  { %4576 = vmatprep.subr.mxu1 %v6345_v43  ;;  %4474 = vmatpush1.msra.mxu0 %v6965_v12 }
 0x410   :  { %4578 = vmatpush1.msra.mxu1 %v6323_v29  ;;  %4478 = vmatprep.subr.mxu0 %v6966_v1 }
 0x411   :  { %4580 = vmatprep.subr.mxu1 %v6365_v11  ;;  %4482 = vmatpush1.msra.mxu0 %v6967_v59 }
 0x412   :  { %4582 = vmatpush1.msra.mxu1 %v6370_v49  ;;  %4486 = vmatprep.subr.mxu0 %v4062_v47 }
 0x413   :  { %4584 = vmatprep.subr.mxu1 %v6381_v48  ;;  %4490 = vmatpush1.msra.mxu0 %v6968_v0 }
 0x414   :  { %4586 = vmatpush1.msra.mxu1 %v6390_v28  ;;  %4494 = vmatprep.subr.mxu0 %v4074_v38 }
 0x415   :  { %4588 = vmatprep.subr.mxu1 %v6401_v56  ;;  %4498 = vmatpush1.msra.mxu0 %v4080_v3 }
 0x416   :  { %4590 = vmatpush1.msra.mxu1 %v6409_v27  ;;  %4502 = vmatprep.subr.mxu0 %v4086_v18 }
 0x417   :  { %4592 = vmatprep.subr.mxu1 %v6350_v62  ;;  %4506 = vmatpush1.msra.mxu0 %v4092_v42 }
 0x418   :  { %4539 = vmatprep.mubr.f32.mxu0 %v6868_v14  ;;  %4594 = vmatpush1.msra.mxu1 %v6360_v40 }
 0x419   :  { %4541 = vmatmul.mubr.f32.vlgmr.msra.gmra.mxu0 %v6140_v10  ;;  %4596 = vmatprep.subr.mxu1 %v6443_v21 }
 0x41a   :  { %4598 = vmatpush1.msra.mxu1 %v6452_v20  ;;  %4643 = vmatprep.mubr.f32.mxu1 %v6868_v14 }
 0x41b   :  { %4600 = vmatprep.subr.mxu1 %v6459_v46 }
 0x41c   :  { %4602 = vmatpush1.msra.mxu1 %v6468_v37 }
 0x41d   :  { %4604 = vmatprep.subr.mxu1 %v6478_v2 }
 0x41e   :  { %4606 = vmatpush1.msra.mxu1 %v6493_v57 }
 0x41f   :  { %4608 = vmatprep.subr.mxu1 %v6500_v26 }
 0x420   :  { %4610 = vmatpush1.msra.mxu1 %v6513_v60 }
 0x421   :  { %4645 = vmatmul.mubr.f32.vlgmr.msra.gmra.mxu1 %v6140_v10 }
 0x477   :  { %v3044_v29 = vpop.f32.mrf.mxu0 }
 0x479   :  { %v3046_v43 = vpop.f32.mrf.mxu0 }
 0x47e   :  { %v3276_v62 = vpop.f32.mrf.mxu1 }
 0x47f   :  { %v3277_v42 = vadd.f32 %v3276_v62, %v3044_v29 }
 0x480   :  { %v3278_v11 = vpop.f32.mrf.mxu1 }
 0x481   :  { %v3279_v38 = vadd.f32 %v3278_v11, %v3046_v43 }
 0x489   :  { %v3413_v40 = vpop.f32.mrf.mxu0 }
 0x48a   :  { %v3414_v21 = vadd.f32 %v3413_v40, %v3277_v42 }
 0x48b   :  { %v3415_v14 = vpop.f32.mrf.mxu0 }
 0x48c   :  { %v3416_v51 = vadd.f32 %v3415_v14, %v3279_v38 }
 0x492   :  { %v3519_v49 = vpop.f32.mrf.mxu1 }
 0x493   :  { %v3520_v20 = vadd.f32 %v3519_v49, %v3414_v21  ;;  %v4734_v21 = vld [vmem:[%s6716_s0 + $0x8] sm:$0xff] }
 0x494   :  { %v3521_v9 = vpop.f32.mrf.mxu1 }
 0x495   :  { %v3522_v22 = vadd.f32 %v3521_v9, %v3416_v51  ;;  %v4733_v51 = vld [vmem:[%s6716_s0] sm:$0xff] }
 0x49d   :  { %v3687_v48 = vpop.f32.mrf.mxu0 }
 0x49e   :  { %v3688_v37 = vadd.f32 %v3687_v48, %v3520_v20  ;;  %v4736_v20 = vld [vmem:[%s6716_s0 + $0x18] sm:$0xff] }
 0x49f   :  { %v3689_v28 = vpop.f32.mrf.mxu0 }
 0x4a0   :  { %v3690_v46 = vadd.f32 %v3689_v28, %v3522_v22 }
 0x4a6   :  { %v3791_v52 = vpop.f32.mrf.mxu1 }
 0x4a7   :  { %v3792_v7 = vadd.f32 %v3791_v52, %v3688_v37 }
 0x4a8   :  { %v3793_v27 = vpop.f32.mrf.mxu1 }
 0x4a9   :  { %v3794_v16 = vadd.f32 %v3793_v27, %v3690_v46  ;;  %v4657_v54 = vmul.f32 %v3792_v7, %v3792_v7 }
 0x4ab   :  { %v4658_v23 = vmul.f32 %v3794_v16, %v3794_v16  ;;  %v4651_v34 = vadd.f32 %v3794_v16, %v3792_v7 }
 0x4ad   :  { %v4661_v3 = vadd.f32 %v4658_v23, %v4657_v54 }
 0x4b2   :  { %v3899_v56 = vpop.f32.mrf.mxu0 }
 0x4b4   :  { %v3901_v45 = vpop.f32.mrf.mxu0 }
 0x4ba   :  { %v4131_v31 = vpop.f32.mrf.mxu1 }
 0x4bb   :  { %v4132_v44 = vadd.f32 %v4131_v31, %v3899_v56 }
 0x4bc   :  { %v4133_v10 = vpop.f32.mrf.mxu1 }
 0x4bd   :  { %v4134_v2 = vadd.f32 %v4133_v10, %v3901_v45 }
 0x4c5   :  { %v4268_v41 = vpop.f32.mrf.mxu0 }
 0x4c6   :  { %v4269_v53 = vadd.f32 %v4268_v41, %v4132_v44 }
 0x4c7   :  { %v4270_v25 = vpop.f32.mrf.mxu0 }
 0x4c8   :  { %v4271_v57 = vadd.f32 %v4270_v25, %v4134_v2  ;;  %v4735_v25 = vld [vmem:[%s6716_s0 + $0x10] sm:$0xff] }
 0x4ce   :  { %v4374_v36 = vpop.f32.mrf.mxu1 }
 0x4cf   :  { %v4375_v61 = vadd.f32 %v4374_v36, %v4269_v53 }
 0x4d0   :  { %v4376_v47 = vpop.f32.mrf.mxu1 }
 0x4d1   :  { %v4377_v60 = vadd.f32 %v4376_v47, %v4271_v57 }
 0x4d9   :  { %v4542_v58 = vpop.f32.mrf.mxu0 }
 0x4da   :  { %v4543_v30 = vadd.f32 %v4542_v58, %v4375_v61 }
 0x4db   :  { %v4544_v26 = vpop.f32.mrf.mxu0 }
 0x4dc   :  { %v4545_v4 = vadd.f32 %v4544_v26, %v4377_v60 }
 0x4e1   :  { %v4646_v18 = vpop.f32.mrf.mxu1 }
 0x4e2   :  { %v4647_v13 = vadd.f32 %v4646_v18, %v4543_v30 }
 0x4e3   :  { %v4648_v15 = vpop.f32.mrf.mxu1 }
 0x4e4   :  { %v4652_v33 = vadd.f32 %v4651_v34, %v4647_v13  ;;  %v4659_v55 = vmul.f32 %v4647_v13, %v4647_v13  ;;  %v4649_v17 = vadd.f32 %v4648_v15, %v4545_v4 }
 0x4e6   :  { %v4660_v24 = vmul.f32 %v4649_v17, %v4649_v17  ;;  %v4653_v5 = vadd.f32 %v4652_v33, %v4649_v17  ;;  %v4662_v50 = vadd.f32 %v4661_v3, %v4659_v55 }
 0x4e8   :  { %4654 = vadd.xlane.f32.xlu0 %v4653_v5  ;;  %v4663_v32 = vadd.f32 %v4662_v50, %v4660_v24 }
 0x4ea   :  { %4664 = vadd.xlane.f32.xlu1 %v4663_v32 }
 0x4fb   :  { %4690 = vperm.xlu1 %4728, %v2564_v6  }
 0x4fe   :  { %4681 = vperm.xlu0 %4727, %v2563_v63  }
 0x571   :  { %v4655_v35 = vpop.xlane.xlu0 %4654 }
 0x572   :  { %v4656_v8 = vmul.f32 0.001953125, %v4655_v35 }
 0x573   :  { %v4665_v39 = vpop.xlane.xlu1 %4664 }
 0x574   :  { %v4666_v19 = vmul.f32 0.001953125, %v4665_v39  ;;  %v4667_v12 = vmul.f32 %v4656_v8, %v4656_v8  ;;  %v4669_v0 = vsub.f32 %v3792_v7, %v4656_v8  ;;  %v4670_v29 = vsub.f32 %v3794_v16, %v4656_v8 }
 0x575   :  { %v4671_v43 = vsub.f32 %v4647_v13, %v4656_v8  ;;  %v4672_v62 = vsub.f32 %v4649_v17, %v4656_v8 }
 0x576   :  { %v4668_v1 = vsub.f32 %v4666_v19, %v4667_v12 }
 0x577   :  { %v4691_v45 = vpop.permute.xlu1 %4690 }
 0x578   :  { %v4673_v59 = vadd.f32 1e-05, %v4668_v1 }
 0x579   :  { %v4682_v9 = vpop.permute.xlu0 %4681 }
 0x57a   :  { %4731 = vrsqrt.f32 %v4673_v59 }
 0x587   :  { %v4732_v40 = vpop.eup %4731 }
 0x588   :  { %v4675_v11 = vmul.f32 %v4732_v40, %v4669_v0  ;;  %v4676_v14 = vmul.f32 %v4732_v40, %v4670_v29  ;;  %v4677_v49 = vmul.f32 %v4732_v40, %v4671_v43  ;;  %v4678_v48 = vmul.f32 %v4732_v40, %v4672_v62 }
 0x58a   :  { %v4684_v28 = vmul.f32 %v4682_v9, %v4675_v11  ;;  %v4685_v52 = vmul.f32 %v4682_v9, %v4676_v14  ;;  %v4686_v56 = vmul.f32 %v4682_v9, %v4677_v49  ;;  %v4687_v27 = vmul.f32 %v4682_v9, %v4678_v48 }
 0x58c   :  { %v4693_v31 = vadd.f32 %v4691_v45, %v4684_v28  ;;  %v4694_v38 = vadd.f32 %v4691_v45, %v4685_v52  ;;  %v4695_v41 = vadd.f32 %v4691_v45, %v4686_v56  ;;  %v4696_v42 = vadd.f32 %v4691_v45, %v4687_v27 }
 0x58e   :  { %v4697_v10 = vadd.f32 %v4733_v51, %v4693_v31  ;;  %v4698_v22 = vadd.f32 %v4734_v21, %v4694_v38  ;;  %v4699_v36 = vadd.f32 %v4735_v25, %v4695_v41  ;;  %v4700_v46 = vadd.f32 %v4736_v20, %v4696_v42 }
 0x590   :  { %v4701_v44 = vmax.f32 %v4697_v10, 0.0  ;;  %v4702_v58 = vmax.f32 %v4698_v22, 0.0  ;;  %v4703_v37 = vmax.f32 %v4699_v36, 0.0  ;;  %v4704_v16 = vmax.f32 %v4700_v46, 0.0 }
 0x592   :  { %4705 = vst [vmem:[%s6723_s8] sm:$0xff] %v4701_v44  ;;  %4706 = vst [vmem:[%s6723_s8 + $0x8] sm:$0xff] %v4702_v58 }
 0x593   :  { %4707 = vst [vmem:[%s6723_s8 + $0x10] sm:$0xff] %v4703_v37  ;;  %4708 = vst [vmem:[%s6723_s8 + $0x18] sm:$0xff] %v4704_v16 }

</bundles_post_ra>
